<compile_context>
chip_gen: v5e
topology: v5e:2x2
jax: 0.10.0
libtpu: 0.0.40
codegen_flags: <defaults>
</compile_context>

<pallas_src>
import functools

import jax
import jax.numpy as jnp
from jax import lax
from jax.experimental import pallas as pl
from jax.experimental.pallas import tpu as pltpu


# ----------------------------------------------------------------------------
# Encoder: masked (packed-sequence-equivalent) LSTM over time.
# Grid axis 0 walks time in chunks ("arbitrary" = sequential).  The (B, H)
# output block is resident across the grid and doubles as the h carry; the
# cell state lives in VMEM scratch.
# ----------------------------------------------------------------------------
def encoder_kernel(emb_ref,    # (CHUNK, B, E) bf16  input embeddings (time-major)
                   mask_ref,   # (CHUNK, B, 1) f32   1.0 where t < length[b]
                   wih_ref,    # (4, E, H) bf16      per-gate W_ih^T
                   whh_ref,    # (4, H, H) bf16      per-gate W_hh^T
                   b_ref,      # (4, 1, H) f32       per-gate b_ih + b_hh
                   hid_ref,    # (B, H)   f32 out    resident h carry / final h
                   c_scr,      # (B, H)   f32 scratch (cell state carry)
                   *, chunk):
  f32 = jnp.float32
  bf16 = jnp.bfloat16

  @pl.when(pl.program_id(0) == 0)
  def _init():
    hid_ref[...] = jnp.zeros_like(hid_ref)
    c_scr[...] = jnp.zeros_like(c_scr)

  wih = wih_ref[...]
  whh = whh_ref[...]
  b = b_ref[...]

  h = hid_ref[...]
  c = c_scr[...]

  # Static python loop == fully unrolled chunk (LLO scheduling visibility).
  for u in range(chunk):
    x = emb_ref[u]            # (B, E) bf16
    m = mask_ref[u]           # (B, 1) f32
    not_m = 1.0 - m
    h_bf = h.astype(bf16)

    def gate(g):
      # Per-gate lane-aligned (B, H) tile; bf16 operands, f32 accumulation.
      return (jnp.dot(x, wih[g], preferred_element_type=f32)
              + jnp.dot(h_bf, whh[g], preferred_element_type=f32)
              + b[g])

    i_g = jax.nn.sigmoid(gate(0))   # PyTorch gate order: i, f, g, o
    f_g = jax.nn.sigmoid(gate(1))
    g_g = jnp.tanh(gate(2))
    o_g = jax.nn.sigmoid(gate(3))
    c_new = f_g * c + i_g * g_g
    h_new = o_g * jnp.tanh(c_new)
    # pack_padded_sequence semantics: freeze h/c once t >= length[b].
    h = m * h_new + not_m * h
    c = m * c_new + not_m * c

  hid_ref[...] = h
  c_scr[...] = c


# ----------------------------------------------------------------------------
# Decoder: greedy LSTMCell roll-out + vocab projection + token CE loss.
# The embedding lookup and the input-gate projection are pre-fused into a
# per-gate (V, H) matrix, so each step is 5 matmuls total (4 gates + output
# projection).  Logits/predictions are streamed out per time-chunk; h/c/
# last-pred/loss are carried in VMEM scratch across grid steps.
# ----------------------------------------------------------------------------
def decoder_kernel(h_enc_ref,   # (B, H) f32          encoder final hidden (resident)
                   tgt_ref,     # (CHUNK, B, 1) i32   targets (time-major)
                   wfe_ref,     # (4, V, H) bf16      fused (W_emb @ W_ih^T) per gate
                   whh_ref,     # (4, H, H) bf16      decoder per-gate W_hh^T
                   b_ref,       # (4, 1, H) f32       decoder per-gate bias
                   ow_ref,      # (H, V) bf16         output projection W^T
                   ob_ref,      # (1, V) f32          output projection bias
                   logits_ref,  # (CHUNK, B, V) f32 out  (streamed per chunk)
                   preds_ref,   # (CHUNK, B, 1) i32 out
                   lnum_ref,    # (1, 1) f32 out      sum of token NLLs
                   lden_ref,    # (1, 1) f32 out      count of non-pad tokens
                   h_scr,       # (B, H) f32 scratch
                   c_scr,       # (B, H) f32 scratch
                   pred_scr,    # (B, 1) i32 scratch  greedy feedback carry
                   lsum_scr,    # (B, 1) f32 scratch  per-row loss sum
                   lcnt_scr,    # (B, 1) f32 scratch  per-row valid count
                   *, chunk, start_index, pad_index):
  f32 = jnp.float32
  bf16 = jnp.bfloat16
  B, H = h_scr.shape
  V = ow_ref.shape[1]

  @pl.when(pl.program_id(0) == 0)
  def _init():
    h_scr[...] = h_enc_ref[...]
    c_scr[...] = jnp.zeros_like(c_scr)
    pred_scr[...] = jnp.full((B, 1), start_index, dtype=jnp.int32)
    lsum_scr[...] = jnp.zeros_like(lsum_scr)
    lcnt_scr[...] = jnp.zeros_like(lcnt_scr)

  wfe = wfe_ref[...]
  whh = whh_ref[...]
  b = b_ref[...]
  ow = ow_ref[...]
  ob = ob_ref[...]

  vocab_iota = lax.broadcasted_iota(jnp.int32, (B, V), 1)

  h = h_scr[...]
  c = c_scr[...]
  pred = pred_scr[...]
  lsum = lsum_scr[...]
  lcnt = lcnt_scr[...]

  for u in range(chunk):
    # Greedy-feedback "embed + input projection" of the previous prediction
    # as a single bf16 one-hot x (V, H) matmul per gate (exact row selection;
    # mathematically identical to embedding(pred) @ W_ih^T).
    # TODO(synk): for large vocabularies replace the one-hot matmul with an
    # index gather / per-row DMA and tile the vocab projection over V with an
    # online max/sum-exp/argmax.
    onehot = (vocab_iota == pred).astype(bf16)                     # (B, V)
    h_bf = h.astype(bf16)

    def gate(g):
      return (jnp.dot(onehot, wfe[g], preferred_element_type=f32)
              + jnp.dot(h_bf, whh[g], preferred_element_type=f32)
              + b[g])

    i_g = jax.nn.sigmoid(gate(0))   # PyTorch gate order: i, f, g, o
    f_g = jax.nn.sigmoid(gate(1))
    g_g = jnp.tanh(gate(2))
    o_g = jax.nn.sigmoid(gate(3))
    c = f_g * c + i_g * g_g
    h = o_g * jnp.tanh(c)

    proj = jnp.dot(h.astype(bf16), ow, preferred_element_type=f32) + ob
    logits_ref[u] = proj                                           # streamed out

    # greedy argmax (first maximal index)
    max_val = jnp.max(proj, axis=1, keepdims=True)                 # (B, 1)
    pred = jnp.min(jnp.where(proj == max_val, vocab_iota, V),
                   axis=1, keepdims=True).astype(jnp.int32)        # (B, 1)
    preds_ref[u] = pred

    # token cross-entropy vs target at this timestep, ignoring pad;
    # reuse the max-shifted logits for both logsumexp and the target logit.
    tgt = tgt_ref[u]                                               # (B, 1) i32
    shifted = proj - max_val                                       # (B, V)
    lse_shift = jnp.log(jnp.sum(jnp.exp(shifted), axis=1, keepdims=True))
    tgt_shift = jnp.sum(shifted * (vocab_iota == tgt).astype(f32),
                        axis=1, keepdims=True)                     # (B, 1)
    valid = (tgt != pad_index).astype(f32)                         # (B, 1)
    lsum = lsum + (lse_shift - tgt_shift) * valid
    lcnt = lcnt + valid

  h_scr[...] = h
  c_scr[...] = c
  pred_scr[...] = pred
  lsum_scr[...] = lsum
  lcnt_scr[...] = lcnt

  @pl.when(pl.program_id(0) == pl.num_programs(0) - 1)
  def _finalize():
    lnum_ref[...] = jnp.sum(lsum, axis=0, keepdims=True)           # (1, 1)
    lden_ref[...] = jnp.sum(lcnt, axis=0, keepdims=True)           # (1, 1)


def _pick_chunk(T):
  """Time-chunk (in-kernel unroll factor); must divide T."""
  for c in (4, 2):
    if T % c == 0 and T // c >= 2:
      return c
  return 1


def init_params(key, vocab_size, embedding_size, hidden_size, pad_index):
  """Deterministic init mirroring PyTorch default initializers (shapes only)."""
  ks = jax.random.split(key, 12)
  k = 1.0 / jnp.sqrt(jnp.float32(hidden_size))
  u = lambda kk, shape: jax.random.uniform(kk, shape, jnp.float32, -k, k)

  W_emb = jax.random.normal(ks[0], (vocab_size, embedding_size), jnp.float32)
  W_emb = W_emb.at[pad_index].set(0.0)  # padding_idx row is zero

  return dict(
      W_emb=W_emb,
      enc_W_ih=u(ks[1], (4 * hidden_size, embedding_size)),
      enc_W_hh=u(ks[2], (4 * hidden_size, hidden_size)),
      enc_b_ih=u(ks[3], (4 * hidden_size,)),
      enc_b_hh=u(ks[4], (4 * hidden_size,)),
      dec_W_ih=u(ks[5], (4 * hidden_size, embedding_size)),
      dec_W_hh=u(ks[6], (4 * hidden_size, hidden_size)),
      dec_b_ih=u(ks[7], (4 * hidden_size,)),
      dec_b_hh=u(ks[8], (4 * hidden_size,)),
      out_W=u(ks[9], (vocab_size, hidden_size)),
      out_b=u(ks[10], (vocab_size,)),
  )


def seq2seq_forward(sentence, params, *, start_index, pad_index):
  """Full Seq2Seq forward pass; returns the PyTorch output_dict."""
  B, T = sentence.shape
  V, E = params['W_emb'].shape
  H = params['enc_W_hh'].shape[1]
  f32, bf16 = jnp.float32, jnp.bfloat16

  chunk = _pick_chunk(T)
  grid = (T // chunk,)

  # ---- glue (plain JAX): lengths, encoder embedding lookup, layouts --------
  lengths = jnp.sum(sentence != pad_index, axis=1)                 # (B,)
  w_emb_bf = params['W_emb'].astype(bf16)                          # (V, E)
  emb = jnp.take(w_emb_bf, sentence, axis=0)                       # (B, T, E)
  emb_tbe = jnp.transpose(emb, (1, 0, 2))                          # (T, B, E)
  t_iota = jnp.arange(T)[:, None]
  mask_tb1 = (t_iota < lengths[None, :]).astype(f32)[:, :, None]   # (T, B, 1)
  tgt_tb1 = jnp.transpose(sentence, (1, 0)).astype(jnp.int32)[:, :, None]

  def gate_major(w, in_dim):
    # PyTorch (4H, in) -> gate-major (4, in, H) so each gate is lane-aligned.
    return jnp.transpose(w.reshape(4, H, in_dim), (0, 2, 1))

  e_wih = gate_major(params['enc_W_ih'], E).astype(bf16)
  e_whh = gate_major(params['enc_W_hh'], H).astype(bf16)
  e_b = (params['enc_b_ih'] + params['enc_b_hh']).reshape(4, 1, H).astype(f32)
  # Decoder: fuse embedding table into the input projection (f32 precompute,
  # then one bf16 cast): embedding(pred) @ W_ih_g^T == onehot(pred) @ fused_g.
  d_wih_f32 = gate_major(params['dec_W_ih'], E)                    # (4, E, H)
  d_wfe = jnp.einsum('ve,geh->gvh', params['W_emb'], d_wih_f32).astype(bf16)
  d_whh = gate_major(params['dec_W_hh'], H).astype(bf16)
  d_b = (params['dec_b_ih'] + params['dec_b_hh']).reshape(4, 1, H).astype(f32)
  o_w = params['out_W'].T.astype(bf16)                             # (H, V)
  o_b = params['out_b'][None, :].astype(f32)                       # (1, V)

  cparams = pltpu.CompilerParams(
      dimension_semantics=("arbitrary",),          # sequential time recurrence
      vmem_limit_bytes=48 * 1024 * 1024)           # explicit VMEM budget

  # ---------------------------- encoder call --------------------------------
  h_enc = pl.pallas_call(
      functools.partial(encoder_kernel, chunk=chunk),
      grid=grid,
      in_specs=[
          pl.BlockSpec((chunk, B, E), lambda i: (i, 0, 0)),   # streamed emb
          pl.BlockSpec((chunk, B, 1), lambda i: (i, 0, 0)),   # streamed mask
          pl.BlockSpec((4, E, H), lambda i: (0, 0, 0)),       # resident weights
          pl.BlockSpec((4, H, H), lambda i: (0, 0, 0)),
          pl.BlockSpec((4, 1, H), lambda i: (0, 0, 0)),
      ],
      out_specs=pl.BlockSpec((B, H), lambda i: (0, 0)),       # resident h carry
      out_shape=jax.ShapeDtypeStruct((B, H), f32),
      scratch_shapes=[pltpu.VMEM((B, H), f32)],               # cell state
      compiler_params=cparams,
  )(emb_tbe, mask_tb1, e_wih, e_whh, e_b)

  # ---------------------------- decoder call --------------------------------
  logits_tbv, preds_tb1, lnum, lden = pl.pallas_call(
      functools.partial(decoder_kernel, chunk=chunk,
                        start_index=start_index, pad_index=pad_index),
      grid=grid,
      in_specs=[
          pl.BlockSpec((B, H), lambda i: (0, 0)),             # encoder hidden
          pl.BlockSpec((chunk, B, 1), lambda i: (i, 0, 0)),   # streamed targets
          pl.BlockSpec((4, V, H), lambda i: (0, 0, 0)),       # fused emb+W_ih
          pl.BlockSpec((4, H, H), lambda i: (0, 0, 0)),
          pl.BlockSpec((4, 1, H), lambda i: (0, 0, 0)),
          pl.BlockSpec((H, V), lambda i: (0, 0)),
          pl.BlockSpec((1, V), lambda i: (0, 0)),
      ],
      out_specs=(
          pl.BlockSpec((chunk, B, V), lambda i: (i, 0, 0)),   # streamed logits
          pl.BlockSpec((chunk, B, 1), lambda i: (i, 0, 0)),   # streamed preds
          pl.BlockSpec((1, 1), lambda i: (0, 0)),             # loss numerator
          pl.BlockSpec((1, 1), lambda i: (0, 0)),             # loss denominator
      ),
      out_shape=(
          jax.ShapeDtypeStruct((T, B, V), f32),
          jax.ShapeDtypeStruct((T, B, 1), jnp.int32),
          jax.ShapeDtypeStruct((1, 1), f32),
          jax.ShapeDtypeStruct((1, 1), f32),
      ),
      scratch_shapes=[
          pltpu.VMEM((B, H), f32),         # h carry
          pltpu.VMEM((B, H), f32),         # c carry
          pltpu.VMEM((B, 1), jnp.int32),   # last greedy prediction
          pltpu.VMEM((B, 1), f32),         # per-row loss sum
          pltpu.VMEM((B, 1), f32),         # per-row valid-token count
      ],
      compiler_params=cparams,
  )(h_enc, tgt_tb1, d_wfe, d_whh, d_b, o_w, o_b)

  # mean token CE over non-pad targets, guarded against an all-pad batch
  loss = lnum[0, 0] / jnp.maximum(lden[0, 0], 1.0)

  return {
      'decoder_hidden': h_enc,                                    # (B, H)
      'logits': jnp.transpose(logits_tbv, (1, 0, 2)),             # (B, T, V)
      'predictions': jnp.transpose(preds_tb1[:, :, 0], (1, 0)),   # (B, T) i32
      'loss': loss,
  }


if __name__ == "__main__":
  # Small, deterministic configuration.
  B, T = 2, 8
  vocab_size, embedding_size, hidden_size = 32, 16, 32
  pad_index, start_index, end_index = 0, 1, 2

  key = jax.random.PRNGKey(0)
  k_params, k_tok = jax.random.split(key)

  params = init_params(k_params, vocab_size, embedding_size, hidden_size,
                       pad_index)

  # sentence: batch of padded token-id sequences (lengths 8 and 5).
  lengths = jnp.array([8, 5], dtype=jnp.int32)
  tokens = jax.random.randint(k_tok, (B, T), 3, vocab_size, dtype=jnp.int32)
  pos = jnp.arange(T)[None, :]
  sentence = jnp.where(pos < lengths[:, None], tokens, pad_index).astype(
      jnp.int32)

  out = seq2seq_forward(sentence, params,
                        start_index=start_index, pad_index=pad_index)
  jax.block_until_ready(out)

  assert out['decoder_hidden'].shape == (B, hidden_size)
  assert out['logits'].shape == (B, T, vocab_size)
  assert out['predictions'].shape == (B, T)
  assert bool(jnp.isfinite(out['loss']))
  print("KERNEL_OK")
</pallas_src>

<mosaic_0001>
module attributes {stable_mosaic.version = 11 : i64} {
  func.func @encoder_kernel(%arg0: i32, %arg1: memref<4x2x16xbf16, #tpu.memory_space<vmem>>, %arg2: memref<4x2x1xf32, #tpu.memory_space<vmem>>, %arg3: memref<4x16x32xbf16, #tpu.memory_space<vmem>>, %arg4: memref<4x32x32xbf16, #tpu.memory_space<vmem>>, %arg5: memref<4x1x32xf32, #tpu.memory_space<vmem>>, %arg6: memref<2x32xf32, #tpu.memory_space<vmem>>, %arg7: memref<2x32xf32, #tpu.memory_space<vmem>>) attributes {dimension_semantics = [#tpu.dimension_semantics<arbitrary>], iteration_bounds = array<i64: 2>, scalar_prefetch = 0 : i64, scratch_operands = 1 : i64, tpu.core_type = #tpu.core_type<tc>, window_params = [{transform_indices = @transform_0, window_bounds = array<i64: 4, 2, 16>}, {transform_indices = @transform_1, window_bounds = array<i64: 4, 2, 1>}, {pipeline_mode = #tpu.pipeline_mode<synchronous>, transform_indices = @transform_2, window_bounds = array<i64: 4, 16, 32>}, {pipeline_mode = #tpu.pipeline_mode<synchronous>, transform_indices = @transform_3, window_bounds = array<i64: 4, 32, 32>}, {pipeline_mode = #tpu.pipeline_mode<synchronous>, transform_indices = @transform_4, window_bounds = array<i64: 4, 1, 32>}, {pipeline_mode = #tpu.pipeline_mode<synchronous>, transform_indices = @transform_5, window_bounds = array<i64: 2, 32>}]} {
    %c0_i32 = arith.constant 0 : i32
    %0 = arith.cmpi eq, %arg0, %c0_i32 : i32
    %1 = arith.extui %0 : i1 to i32
    %c0_i32_0 = arith.constant 0 : i32
    %2 = arith.cmpi ne, %1, %c0_i32_0 : i32
    scf.if %2 {
      %cst_85 = arith.constant 0.000000e+00 : f32
      %338 = vector.broadcast %cst_85 : f32 to vector<2x32xf32>
      %c0_86 = arith.constant 0 : index
      %c0_87 = arith.constant 0 : index
      %339 = vector.load %arg6[%c0_86, %c0_87] : memref<2x32xf32, #tpu.memory_space<vmem>>, vector<2x32xf32>
      tpu.vector_store %arg6[%c0_86, %c0_87], %338 {strides = array<i32>} : memref<2x32xf32, #tpu.memory_space<vmem>>, vector<2x32xf32>,
      %cst_88 = arith.constant 0.000000e+00 : f32
      %340 = vector.broadcast %cst_88 : f32 to vector<2x32xf32>
      %c0_89 = arith.constant 0 : index
      %c0_90 = arith.constant 0 : index
      %341 = vector.load %arg7[%c0_89, %c0_90] : memref<2x32xf32, #tpu.memory_space<vmem>>, vector<2x32xf32>
      tpu.vector_store %arg7[%c0_89, %c0_90], %340 {strides = array<i32>} : memref<2x32xf32, #tpu.memory_space<vmem>>, vector<2x32xf32>,
    } else {
    }
    %c0 = arith.constant 0 : index
    %c0_1 = arith.constant 0 : index
    %c0_2 = arith.constant 0 : index
    %3 = vector.load %arg3[%c0, %c0_1, %c0_2] : memref<4x16x32xbf16, #tpu.memory_space<vmem>>, vector<4x16x32xbf16>
    %c0_3 = arith.constant 0 : index
    %c0_4 = arith.constant 0 : index
    %c0_5 = arith.constant 0 : index
    %4 = vector.load %arg4[%c0_3, %c0_4, %c0_5] : memref<4x32x32xbf16, #tpu.memory_space<vmem>>, vector<4x32x32xbf16>
    %c0_6 = arith.constant 0 : index
    %c0_7 = arith.constant 0 : index
    %c0_8 = arith.constant 0 : index
    %5 = vector.load %arg5[%c0_6, %c0_7, %c0_8] : memref<4x1x32xf32, #tpu.memory_space<vmem>>, vector<4x1x32xf32>
    %c0_9 = arith.constant 0 : index
    %c0_10 = arith.constant 0 : index
    %6 = vector.load %arg6[%c0_9, %c0_10] : memref<2x32xf32, #tpu.memory_space<vmem>>, vector<2x32xf32>
    %c0_11 = arith.constant 0 : index
    %c0_12 = arith.constant 0 : index
    %7 = vector.load %arg7[%c0_11, %c0_12] : memref<2x32xf32, #tpu.memory_space<vmem>>, vector<2x32xf32>
    %c0_13 = arith.constant 0 : index
    %c0_14 = arith.constant 0 : index
    %c0_15 = arith.constant 0 : index
    %8 = vector.load %arg1[%c0_13, %c0_14, %c0_15] : memref<4x2x16xbf16, #tpu.memory_space<vmem>>, vector<1x2x16xbf16>
    %9 = vector.shape_cast %8 : vector<1x2x16xbf16> to vector<2x16xbf16>
    %c0_16 = arith.constant 0 : index
    %c0_17 = arith.constant 0 : index
    %c0_18 = arith.constant 0 : index
    %10 = vector.load %arg2[%c0_16, %c0_17, %c0_18] : memref<4x2x1xf32, #tpu.memory_space<vmem>>, vector<1x2x1xf32>
    %11 = vector.shape_cast %10 : vector<1x2x1xf32> to vector<2x1xf32>
    %cst = arith.constant 1.000000e+00 : f32
    %12 = vector.broadcast %cst : f32 to vector<2x1xf32>
    %13 = arith.subf %12, %11 : vector<2x1xf32>
    %14 = arith.truncf %6 : vector<2x32xf32> to vector<2x32xbf16>
    %15 = vector.extract_strided_slice %3 {offsets = [0, 0, 0], sizes = [1, 16, 32], strides = [1, 1, 1]} : vector<4x16x32xbf16> to vector<1x16x32xbf16>
    %16 = vector.shape_cast %15 : vector<1x16x32xbf16> to vector<16x32xbf16>
    %cst_19 = arith.constant dense<0.000000e+00> : vector<2x32xf32>
    %17 = tpu.matmul %9, %16, %cst_19 {dimension_numbers = #tpu.dot_dimension_numbers<[1], [0], [0], [1], [0, 0, 1, 1], [], []>} : vector<2x16xbf16>, vector<16x32xbf16>, vector<2x32xf32> -> vector<2x32xf32>
    %18 = vector.extract_strided_slice %4 {offsets = [0, 0, 0], sizes = [1, 32, 32], strides = [1, 1, 1]} : vector<4x32x32xbf16> to vector<1x32x32xbf16>
    %19 = vector.shape_cast %18 : vector<1x32x32xbf16> to vector<32x32xbf16>
    %cst_20 = arith.constant dense<0.000000e+00> : vector<2x32xf32>
    %20 = tpu.matmul %14, %19, %cst_20 {dimension_numbers = #tpu.dot_dimension_numbers<[1], [0], [0], [1], [0, 0, 1, 1], [], []>} : vector<2x32xbf16>, vector<32x32xbf16>, vector<2x32xf32> -> vector<2x32xf32>
    %21 = arith.addf %17, %20 : vector<2x32xf32>
    %22 = vector.extract_strided_slice %5 {offsets = [0, 0, 0], sizes = [1, 1, 32], strides = [1, 1, 1]} : vector<4x1x32xf32> to vector<1x1x32xf32>
    %23 = vector.shape_cast %22 : vector<1x1x32xf32> to vector<1x32xf32>
    %24 = vector.broadcast %23 : vector<1x32xf32> to vector<2x32xf32>
    %25 = arith.addf %21, %24 : vector<2x32xf32>
    %26 = arith.negf %25 : vector<2x32xf32>
    %27 = math.exp %26 : vector<2x32xf32>
    %cst_21 = arith.constant 1.000000e+00 : f32
    %28 = vector.broadcast %cst_21 : f32 to vector<2x32xf32>
    %29 = arith.addf %28, %27 : vector<2x32xf32>
    %30 = arith.divf %28, %29 : vector<2x32xf32>
    %31 = vector.extract_strided_slice %3 {offsets = [1, 0, 0], sizes = [1, 16, 32], strides = [1, 1, 1]} : vector<4x16x32xbf16> to vector<1x16x32xbf16>
    %32 = vector.shape_cast %31 : vector<1x16x32xbf16> to vector<16x32xbf16>
    %cst_22 = arith.constant dense<0.000000e+00> : vector<2x32xf32>
    %33 = tpu.matmul %9, %32, %cst_22 {dimension_numbers = #tpu.dot_dimension_numbers<[1], [0], [0], [1], [0, 0, 1, 1], [], []>} : vector<2x16xbf16>, vector<16x32xbf16>, vector<2x32xf32> -> vector<2x32xf32>
    %34 = vector.extract_strided_slice %4 {offsets = [1, 0, 0], sizes = [1, 32, 32], strides = [1, 1, 1]} : vector<4x32x32xbf16> to vector<1x32x32xbf16>
    %35 = vector.shape_cast %34 : vector<1x32x32xbf16> to vector<32x32xbf16>
    %cst_23 = arith.constant dense<0.000000e+00> : vector<2x32xf32>
    %36 = tpu.matmul %14, %35, %cst_23 {dimension_numbers = #tpu.dot_dimension_numbers<[1], [0], [0], [1], [0, 0, 1, 1], [], []>} : vector<2x32xbf16>, vector<32x32xbf16>, vector<2x32xf32> -> vector<2x32xf32>
    %37 = arith.addf %33, %36 : vector<2x32xf32>
    %38 = vector.extract_strided_slice %5 {offsets = [1, 0, 0], sizes = [1, 1, 32], strides = [1, 1, 1]} : vector<4x1x32xf32> to vector<1x1x32xf32>
    %39 = vector.shape_cast %38 : vector<1x1x32xf32> to vector<1x32xf32>
    %40 = vector.broadcast %39 : vector<1x32xf32> to vector<2x32xf32>
    %41 = arith.addf %37, %40 : vector<2x32xf32>
    %42 = arith.negf %41 : vector<2x32xf32>
    %43 = math.exp %42 : vector<2x32xf32>
    %cst_24 = arith.constant 1.000000e+00 : f32
    %44 = vector.broadcast %cst_24 : f32 to vector<2x32xf32>
    %45 = arith.addf %44, %43 : vector<2x32xf32>
    %46 = arith.divf %44, %45 : vector<2x32xf32>
    %47 = vector.extract_strided_slice %3 {offsets = [2, 0, 0], sizes = [1, 16, 32], strides = [1, 1, 1]} : vector<4x16x32xbf16> to vector<1x16x32xbf16>
    %48 = vector.shape_cast %47 : vector<1x16x32xbf16> to vector<16x32xbf16>
    %cst_25 = arith.constant dense<0.000000e+00> : vector<2x32xf32>
    %49 = tpu.matmul %9, %48, %cst_25 {dimension_numbers = #tpu.dot_dimension_numbers<[1], [0], [0], [1], [0, 0, 1, 1], [], []>} : vector<2x16xbf16>, vector<16x32xbf16>, vector<2x32xf32> -> vector<2x32xf32>
    %50 = vector.extract_strided_slice %4 {offsets = [2, 0, 0], sizes = [1, 32, 32], strides = [1, 1, 1]} : vector<4x32x32xbf16> to vector<1x32x32xbf16>
    %51 = vector.shape_cast %50 : vector<1x32x32xbf16> to vector<32x32xbf16>
    %cst_26 = arith.constant dense<0.000000e+00> : vector<2x32xf32>
    %52 = tpu.matmul %14, %51, %cst_26 {dimension_numbers = #tpu.dot_dimension_numbers<[1], [0], [0], [1], [0, 0, 1, 1], [], []>} : vector<2x32xbf16>, vector<32x32xbf16>, vector<2x32xf32> -> vector<2x32xf32>
    %53 = arith.addf %49, %52 : vector<2x32xf32>
    %54 = vector.extract_strided_slice %5 {offsets = [2, 0, 0], sizes = [1, 1, 32], strides = [1, 1, 1]} : vector<4x1x32xf32> to vector<1x1x32xf32>
    %55 = vector.shape_cast %54 : vector<1x1x32xf32> to vector<1x32xf32>
    %56 = vector.broadcast %55 : vector<1x32xf32> to vector<2x32xf32>
    %57 = arith.addf %53, %56 : vector<2x32xf32>
    %58 = math.tanh %57 : vector<2x32xf32>
    %59 = vector.extract_strided_slice %3 {offsets = [3, 0, 0], sizes = [1, 16, 32], strides = [1, 1, 1]} : vector<4x16x32xbf16> to vector<1x16x32xbf16>
    %60 = vector.shape_cast %59 : vector<1x16x32xbf16> to vector<16x32xbf16>
    %cst_27 = arith.constant dense<0.000000e+00> : vector<2x32xf32>
    %61 = tpu.matmul %9, %60, %cst_27 {dimension_numbers = #tpu.dot_dimension_numbers<[1], [0], [0], [1], [0, 0, 1, 1], [], []>} : vector<2x16xbf16>, vector<16x32xbf16>, vector<2x32xf32> -> vector<2x32xf32>
    %62 = vector.extract_strided_slice %4 {offsets = [3, 0, 0], sizes = [1, 32, 32], strides = [1, 1, 1]} : vector<4x32x32xbf16> to vector<1x32x32xbf16>
    %63 = vector.shape_cast %62 : vector<1x32x32xbf16> to vector<32x32xbf16>
    %cst_28 = arith.constant dense<0.000000e+00> : vector<2x32xf32>
    %64 = tpu.matmul %14, %63, %cst_28 {dimension_numbers = #tpu.dot_dimension_numbers<[1], [0], [0], [1], [0, 0, 1, 1], [], []>} : vector<2x32xbf16>, vector<32x32xbf16>, vector<2x32xf32> -> vector<2x32xf32>
    %65 = arith.addf %61, %64 : vector<2x32xf32>
    %66 = vector.extract_strided_slice %5 {offsets = [3, 0, 0], sizes = [1, 1, 32], strides = [1, 1, 1]} : vector<4x1x32xf32> to vector<1x1x32xf32>
    %67 = vector.shape_cast %66 : vector<1x1x32xf32> to vector<1x32xf32>
    %68 = vector.broadcast %67 : vector<1x32xf32> to vector<2x32xf32>
    %69 = arith.addf %65, %68 : vector<2x32xf32>
    %70 = arith.negf %69 : vector<2x32xf32>
    %71 = math.exp %70 : vector<2x32xf32>
    %cst_29 = arith.constant 1.000000e+00 : f32
    %72 = vector.broadcast %cst_29 : f32 to vector<2x32xf32>
    %73 = arith.addf %72, %71 : vector<2x32xf32>
    %74 = arith.divf %72, %73 : vector<2x32xf32>
    %75 = arith.mulf %46, %7 : vector<2x32xf32>
    %76 = arith.mulf %30, %58 : vector<2x32xf32>
    %77 = arith.addf %75, %76 : vector<2x32xf32>
    %78 = math.tanh %77 : vector<2x32xf32>
    %79 = arith.mulf %74, %78 : vector<2x32xf32>
    %80 = vector.broadcast %11 : vector<2x1xf32> to vector<2x32xf32>
    %81 = arith.mulf %80, %79 : vector<2x32xf32>
    %82 = vector.broadcast %13 : vector<2x1xf32> to vector<2x32xf32>
    %83 = arith.mulf %82, %6 : vector<2x32xf32>
    %84 = arith.addf %81, %83 : vector<2x32xf32>
    %85 = vector.broadcast %11 : vector<2x1xf32> to vector<2x32xf32>
    %86 = arith.mulf %85, %77 : vector<2x32xf32>
    %87 = vector.broadcast %13 : vector<2x1xf32> to vector<2x32xf32>
    %88 = arith.mulf %87, %7 : vector<2x32xf32>
    %89 = arith.addf %86, %88 : vector<2x32xf32>
    %c1 = arith.constant 1 : index
    %c0_30 = arith.constant 0 : index
    %c0_31 = arith.constant 0 : index
    %90 = vector.load %arg1[%c1, %c0_30, %c0_31] : memref<4x2x16xbf16, #tpu.memory_space<vmem>>, vector<1x2x16xbf16>
    %91 = vector.shape_cast %90 : vector<1x2x16xbf16> to vector<2x16xbf16>
    %c1_32 = arith.constant 1 : index
    %c0_33 = arith.constant 0 : index
    %c0_34 = arith.constant 0 : index
    %92 = vector.load %arg2[%c1_32, %c0_33, %c0_34] : memref<4x2x1xf32, #tpu.memory_space<vmem>>, vector<1x2x1xf32>
    %93 = vector.shape_cast %92 : vector<1x2x1xf32> to vector<2x1xf32>
    %cst_35 = arith.constant 1.000000e+00 : f32
    %94 = vector.broadcast %cst_35 : f32 to vector<2x1xf32>
    %95 = arith.subf %94, %93 : vector<2x1xf32>
    %96 = arith.truncf %84 : vector<2x32xf32> to vector<2x32xbf16>
    %97 = vector.extract_strided_slice %3 {offsets = [0, 0, 0], sizes = [1, 16, 32], strides = [1, 1, 1]} : vector<4x16x32xbf16> to vector<1x16x32xbf16>
    %98 = vector.shape_cast %97 : vector<1x16x32xbf16> to vector<16x32xbf16>
    %cst_36 = arith.constant dense<0.000000e+00> : vector<2x32xf32>
    %99 = tpu.matmul %91, %98, %cst_36 {dimension_numbers = #tpu.dot_dimension_numbers<[1], [0], [0], [1], [0, 0, 1, 1], [], []>} : vector<2x16xbf16>, vector<16x32xbf16>, vector<2x32xf32> -> vector<2x32xf32>
    %100 = vector.extract_strided_slice %4 {offsets = [0, 0, 0], sizes = [1, 32, 32], strides = [1, 1, 1]} : vector<4x32x32xbf16> to vector<1x32x32xbf16>
    %101 = vector.shape_cast %100 : vector<1x32x32xbf16> to vector<32x32xbf16>
    %cst_37 = arith.constant dense<0.000000e+00> : vector<2x32xf32>
    %102 = tpu.matmul %96, %101, %cst_37 {dimension_numbers = #tpu.dot_dimension_numbers<[1], [0], [0], [1], [0, 0, 1, 1], [], []>} : vector<2x32xbf16>, vector<32x32xbf16>, vector<2x32xf32> -> vector<2x32xf32>
    %103 = arith.addf %99, %102 : vector<2x32xf32>
    %104 = vector.extract_strided_slice %5 {offsets = [0, 0, 0], sizes = [1, 1, 32], strides = [1, 1, 1]} : vector<4x1x32xf32> to vector<1x1x32xf32>
    %105 = vector.shape_cast %104 : vector<1x1x32xf32> to vector<1x32xf32>
    %106 = vector.broadcast %105 : vector<1x32xf32> to vector<2x32xf32>
    %107 = arith.addf %103, %106 : vector<2x32xf32>
    %108 = arith.negf %107 : vector<2x32xf32>
    %109 = math.exp %108 : vector<2x32xf32>
    %cst_38 = arith.constant 1.000000e+00 : f32
    %110 = vector.broadcast %cst_38 : f32 to vector<2x32xf32>
    %111 = arith.addf %110, %109 : vector<2x32xf32>
    %112 = arith.divf %110, %111 : vector<2x32xf32>
    %113 = vector.extract_strided_slice %3 {offsets = [1, 0, 0], sizes = [1, 16, 32], strides = [1, 1, 1]} : vector<4x16x32xbf16> to vector<1x16x32xbf16>
    %114 = vector.shape_cast %113 : vector<1x16x32xbf16> to vector<16x32xbf16>
    %cst_39 = arith.constant dense<0.000000e+00> : vector<2x32xf32>
    %115 = tpu.matmul %91, %114, %cst_39 {dimension_numbers = #tpu.dot_dimension_numbers<[1], [0], [0], [1], [0, 0, 1, 1], [], []>} : vector<2x16xbf16>, vector<16x32xbf16>, vector<2x32xf32> -> vector<2x32xf32>
    %116 = vector.extract_strided_slice %4 {offsets = [1, 0, 0], sizes = [1, 32, 32], strides = [1, 1, 1]} : vector<4x32x32xbf16> to vector<1x32x32xbf16>
    %117 = vector.shape_cast %116 : vector<1x32x32xbf16> to vector<32x32xbf16>
    %cst_40 = arith.constant dense<0.000000e+00> : vector<2x32xf32>
    %118 = tpu.matmul %96, %117, %cst_40 {dimension_numbers = #tpu.dot_dimension_numbers<[1], [0], [0], [1], [0, 0, 1, 1], [], []>} : vector<2x32xbf16>, vector<32x32xbf16>, vector<2x32xf32> -> vector<2x32xf32>
    %119 = arith.addf %115, %118 : vector<2x32xf32>
    %120 = vector.extract_strided_slice %5 {offsets = [1, 0, 0], sizes = [1, 1, 32], strides = [1, 1, 1]} : vector<4x1x32xf32> to vector<1x1x32xf32>
    %121 = vector.shape_cast %120 : vector<1x1x32xf32> to vector<1x32xf32>
    %122 = vector.broadcast %121 : vector<1x32xf32> to vector<2x32xf32>
    %123 = arith.addf %119, %122 : vector<2x32xf32>
    %124 = arith.negf %123 : vector<2x32xf32>
    %125 = math.exp %124 : vector<2x32xf32>
    %cst_41 = arith.constant 1.000000e+00 : f32
    %126 = vector.broadcast %cst_41 : f32 to vector<2x32xf32>
    %127 = arith.addf %126, %125 : vector<2x32xf32>
    %128 = arith.divf %126, %127 : vector<2x32xf32>
    %129 = vector.extract_strided_slice %3 {offsets = [2, 0, 0], sizes = [1, 16, 32], strides = [1, 1, 1]} : vector<4x16x32xbf16> to vector<1x16x32xbf16>
    %130 = vector.shape_cast %129 : vector<1x16x32xbf16> to vector<16x32xbf16>
    %cst_42 = arith.constant dense<0.000000e+00> : vector<2x32xf32>
    %131 = tpu.matmul %91, %130, %cst_42 {dimension_numbers = #tpu.dot_dimension_numbers<[1], [0], [0], [1], [0, 0, 1, 1], [], []>} : vector<2x16xbf16>, vector<16x32xbf16>, vector<2x32xf32> -> vector<2x32xf32>
    %132 = vector.extract_strided_slice %4 {offsets = [2, 0, 0], sizes = [1, 32, 32], strides = [1, 1, 1]} : vector<4x32x32xbf16> to vector<1x32x32xbf16>
    %133 = vector.shape_cast %132 : vector<1x32x32xbf16> to vector<32x32xbf16>
    %cst_43 = arith.constant dense<0.000000e+00> : vector<2x32xf32>
    %134 = tpu.matmul %96, %133, %cst_43 {dimension_numbers = #tpu.dot_dimension_numbers<[1], [0], [0], [1], [0, 0, 1, 1], [], []>} : vector<2x32xbf16>, vector<32x32xbf16>, vector<2x32xf32> -> vector<2x32xf32>
    %135 = arith.addf %131, %134 : vector<2x32xf32>
    %136 = vector.extract_strided_slice %5 {offsets = [2, 0, 0], sizes = [1, 1, 32], strides = [1, 1, 1]} : vector<4x1x32xf32> to vector<1x1x32xf32>
    %137 = vector.shape_cast %136 : vector<1x1x32xf32> to vector<1x32xf32>
    %138 = vector.broadcast %137 : vector<1x32xf32> to vector<2x32xf32>
    %139 = arith.addf %135, %138 : vector<2x32xf32>
    %140 = math.tanh %139 : vector<2x32xf32>
    %141 = vector.extract_strided_slice %3 {offsets = [3, 0, 0], sizes = [1, 16, 32], strides = [1, 1, 1]} : vector<4x16x32xbf16> to vector<1x16x32xbf16>
    %142 = vector.shape_cast %141 : vector<1x16x32xbf16> to vector<16x32xbf16>
    %cst_44 = arith.constant dense<0.000000e+00> : vector<2x32xf32>
    %143 = tpu.matmul %91, %142, %cst_44 {dimension_numbers = #tpu.dot_dimension_numbers<[1], [0], [0], [1], [0, 0, 1, 1], [], []>} : vector<2x16xbf16>, vector<16x32xbf16>, vector<2x32xf32> -> vector<2x32xf32>
    %144 = vector.extract_strided_slice %4 {offsets = [3, 0, 0], sizes = [1, 32, 32], strides = [1, 1, 1]} : vector<4x32x32xbf16> to vector<1x32x32xbf16>
    %145 = vector.shape_cast %144 : vector<1x32x32xbf16> to vector<32x32xbf16>
    %cst_45 = arith.constant dense<0.000000e+00> : vector<2x32xf32>
    %146 = tpu.matmul %96, %145, %cst_45 {dimension_numbers = #tpu.dot_dimension_numbers<[1], [0], [0], [1], [0, 0, 1, 1], [], []>} : vector<2x32xbf16>, vector<32x32xbf16>, vector<2x32xf32> -> vector<2x32xf32>
    %147 = arith.addf %143, %146 : vector<2x32xf32>
    %148 = vector.extract_strided_slice %5 {offsets = [3, 0, 0], sizes = [1, 1, 32], strides = [1, 1, 1]} : vector<4x1x32xf32> to vector<1x1x32xf32>
    %149 = vector.shape_cast %148 : vector<1x1x32xf32> to vector<1x32xf32>
    %150 = vector.broadcast %149 : vector<1x32xf32> to vector<2x32xf32>
    %151 = arith.addf %147, %150 : vector<2x32xf32>
    %152 = arith.negf %151 : vector<2x32xf32>
    %153 = math.exp %152 : vector<2x32xf32>
    %cst_46 = arith.constant 1.000000e+00 : f32
    %154 = vector.broadcast %cst_46 : f32 to vector<2x32xf32>
    %155 = arith.addf %154, %153 : vector<2x32xf32>
    %156 = arith.divf %154, %155 : vector<2x32xf32>
    %157 = arith.mulf %128, %89 : vector<2x32xf32>
    %158 = arith.mulf %112, %140 : vector<2x32xf32>
    %159 = arith.addf %157, %158 : vector<2x32xf32>
    %160 = math.tanh %159 : vector<2x32xf32>
    %161 = arith.mulf %156, %160 : vector<2x32xf32>
    %162 = vector.broadcast %93 : vector<2x1xf32> to vector<2x32xf32>
    %163 = arith.mulf %162, %161 : vector<2x32xf32>
    %164 = vector.broadcast %95 : vector<2x1xf32> to vector<2x32xf32>
    %165 = arith.mulf %164, %84 : vector<2x32xf32>
    %166 = arith.addf %163, %165 : vector<2x32xf32>
    %167 = vector.broadcast %93 : vector<2x1xf32> to vector<2x32xf32>
    %168 = arith.mulf %167, %159 : vector<2x32xf32>
    %169 = vector.broadcast %95 : vector<2x1xf32> to vector<2x32xf32>
    %170 = arith.mulf %169, %89 : vector<2x32xf32>
    %171 = arith.addf %168, %170 : vector<2x32xf32>
    %c2 = arith.constant 2 : index
    %c0_47 = arith.constant 0 : index
    %c0_48 = arith.constant 0 : index
    %172 = vector.load %arg1[%c2, %c0_47, %c0_48] : memref<4x2x16xbf16, #tpu.memory_space<vmem>>, vector<1x2x16xbf16>
    %173 = vector.shape_cast %172 : vector<1x2x16xbf16> to vector<2x16xbf16>
    %c2_49 = arith.constant 2 : index
    %c0_50 = arith.constant 0 : index
    %c0_51 = arith.constant 0 : index
    %174 = vector.load %arg2[%c2_49, %c0_50, %c0_51] : memref<4x2x1xf32, #tpu.memory_space<vmem>>, vector<1x2x1xf32>
    %175 = vector.shape_cast %174 : vector<1x2x1xf32> to vector<2x1xf32>
    %cst_52 = arith.constant 1.000000e+00 : f32
    %176 = vector.broadcast %cst_52 : f32 to vector<2x1xf32>
    %177 = arith.subf %176, %175 : vector<2x1xf32>
    %178 = arith.truncf %166 : vector<2x32xf32> to vector<2x32xbf16>
    %179 = vector.extract_strided_slice %3 {offsets = [0, 0, 0], sizes = [1, 16, 32], strides = [1, 1, 1]} : vector<4x16x32xbf16> to vector<1x16x32xbf16>
    %180 = vector.shape_cast %179 : vector<1x16x32xbf16> to vector<16x32xbf16>
    %cst_53 = arith.constant dense<0.000000e+00> : vector<2x32xf32>
    %181 = tpu.matmul %173, %180, %cst_53 {dimension_numbers = #tpu.dot_dimension_numbers<[1], [0], [0], [1], [0, 0, 1, 1], [], []>} : vector<2x16xbf16>, vector<16x32xbf16>, vector<2x32xf32> -> vector<2x32xf32>
    %182 = vector.extract_strided_slice %4 {offsets = [0, 0, 0], sizes = [1, 32, 32], strides = [1, 1, 1]} : vector<4x32x32xbf16> to vector<1x32x32xbf16>
    %183 = vector.shape_cast %182 : vector<1x32x32xbf16> to vector<32x32xbf16>
    %cst_54 = arith.constant dense<0.000000e+00> : vector<2x32xf32>
    %184 = tpu.matmul %178, %183, %cst_54 {dimension_numbers = #tpu.dot_dimension_numbers<[1], [0], [0], [1], [0, 0, 1, 1], [], []>} : vector<2x32xbf16>, vector<32x32xbf16>, vector<2x32xf32> -> vector<2x32xf32>
    %185 = arith.addf %181, %184 : vector<2x32xf32>
    %186 = vector.extract_strided_slice %5 {offsets = [0, 0, 0], sizes = [1, 1, 32], strides = [1, 1, 1]} : vector<4x1x32xf32> to vector<1x1x32xf32>
    %187 = vector.shape_cast %186 : vector<1x1x32xf32> to vector<1x32xf32>
    %188 = vector.broadcast %187 : vector<1x32xf32> to vector<2x32xf32>
    %189 = arith.addf %185, %188 : vector<2x32xf32>
    %190 = arith.negf %189 : vector<2x32xf32>
    %191 = math.exp %190 : vector<2x32xf32>
    %cst_55 = arith.constant 1.000000e+00 : f32
    %192 = vector.broadcast %cst_55 : f32 to vector<2x32xf32>
    %193 = arith.addf %192, %191 : vector<2x32xf32>
    %194 = arith.divf %192, %193 : vector<2x32xf32>
    %195 = vector.extract_strided_slice %3 {offsets = [1, 0, 0], sizes = [1, 16, 32], strides = [1, 1, 1]} : vector<4x16x32xbf16> to vector<1x16x32xbf16>
    %196 = vector.shape_cast %195 : vector<1x16x32xbf16> to vector<16x32xbf16>
    %cst_56 = arith.constant dense<0.000000e+00> : vector<2x32xf32>
    %197 = tpu.matmul %173, %196, %cst_56 {dimension_numbers = #tpu.dot_dimension_numbers<[1], [0], [0], [1], [0, 0, 1, 1], [], []>} : vector<2x16xbf16>, vector<16x32xbf16>, vector<2x32xf32> -> vector<2x32xf32>
    %198 = vector.extract_strided_slice %4 {offsets = [1, 0, 0], sizes = [1, 32, 32], strides = [1, 1, 1]} : vector<4x32x32xbf16> to vector<1x32x32xbf16>
    %199 = vector.shape_cast %198 : vector<1x32x32xbf16> to vector<32x32xbf16>
    %cst_57 = arith.constant dense<0.000000e+00> : vector<2x32xf32>
    %200 = tpu.matmul %178, %199, %cst_57 {dimension_numbers = #tpu.dot_dimension_numbers<[1], [0], [0], [1], [0, 0, 1, 1], [], []>} : vector<2x32xbf16>, vector<32x32xbf16>, vector<2x32xf32> -> vector<2x32xf32>
    %201 = arith.addf %197, %200 : vector<2x32xf32>
    %202 = vector.extract_strided_slice %5 {offsets = [1, 0, 0], sizes = [1, 1, 32], strides = [1, 1, 1]} : vector<4x1x32xf32> to vector<1x1x32xf32>
    %203 = vector.shape_cast %202 : vector<1x1x32xf32> to vector<1x32xf32>
    %204 = vector.broadcast %203 : vector<1x32xf32> to vector<2x32xf32>
    %205 = arith.addf %201, %204 : vector<2x32xf32>
    %206 = arith.negf %205 : vector<2x32xf32>
    %207 = math.exp %206 : vector<2x32xf32>
    %cst_58 = arith.constant 1.000000e+00 : f32
    %208 = vector.broadcast %cst_58 : f32 to vector<2x32xf32>
    %209 = arith.addf %208, %207 : vector<2x32xf32>
    %210 = arith.divf %208, %209 : vector<2x32xf32>
    %211 = vector.extract_strided_slice %3 {offsets = [2, 0, 0], sizes = [1, 16, 32], strides = [1, 1, 1]} : vector<4x16x32xbf16> to vector<1x16x32xbf16>
    %212 = vector.shape_cast %211 : vector<1x16x32xbf16> to vector<16x32xbf16>
    %cst_59 = arith.constant dense<0.000000e+00> : vector<2x32xf32>
    %213 = tpu.matmul %173, %212, %cst_59 {dimension_numbers = #tpu.dot_dimension_numbers<[1], [0], [0], [1], [0, 0, 1, 1], [], []>} : vector<2x16xbf16>, vector<16x32xbf16>, vector<2x32xf32> -> vector<2x32xf32>
    %214 = vector.extract_strided_slice %4 {offsets = [2, 0, 0], sizes = [1, 32, 32], strides = [1, 1, 1]} : vector<4x32x32xbf16> to vector<1x32x32xbf16>
    %215 = vector.shape_cast %214 : vector<1x32x32xbf16> to vector<32x32xbf16>
    %cst_60 = arith.constant dense<0.000000e+00> : vector<2x32xf32>
    %216 = tpu.matmul %178, %215, %cst_60 {dimension_numbers = #tpu.dot_dimension_numbers<[1], [0], [0], [1], [0, 0, 1, 1], [], []>} : vector<2x32xbf16>, vector<32x32xbf16>, vector<2x32xf32> -> vector<2x32xf32>
    %217 = arith.addf %213, %216 : vector<2x32xf32>
    %218 = vector.extract_strided_slice %5 {offsets = [2, 0, 0], sizes = [1, 1, 32], strides = [1, 1, 1]} : vector<4x1x32xf32> to vector<1x1x32xf32>
    %219 = vector.shape_cast %218 : vector<1x1x32xf32> to vector<1x32xf32>
    %220 = vector.broadcast %219 : vector<1x32xf32> to vector<2x32xf32>
    %221 = arith.addf %217, %220 : vector<2x32xf32>
    %222 = math.tanh %221 : vector<2x32xf32>
    %223 = vector.extract_strided_slice %3 {offsets = [3, 0, 0], sizes = [1, 16, 32], strides = [1, 1, 1]} : vector<4x16x32xbf16> to vector<1x16x32xbf16>
    %224 = vector.shape_cast %223 : vector<1x16x32xbf16> to vector<16x32xbf16>
    %cst_61 = arith.constant dense<0.000000e+00> : vector<2x32xf32>
    %225 = tpu.matmul %173, %224, %cst_61 {dimension_numbers = #tpu.dot_dimension_numbers<[1], [0], [0], [1], [0, 0, 1, 1], [], []>} : vector<2x16xbf16>, vector<16x32xbf16>, vector<2x32xf32> -> vector<2x32xf32>
    %226 = vector.extract_strided_slice %4 {offsets = [3, 0, 0], sizes = [1, 32, 32], strides = [1, 1, 1]} : vector<4x32x32xbf16> to vector<1x32x32xbf16>
    %227 = vector.shape_cast %226 : vector<1x32x32xbf16> to vector<32x32xbf16>
    %cst_62 = arith.constant dense<0.000000e+00> : vector<2x32xf32>
    %228 = tpu.matmul %178, %227, %cst_62 {dimension_numbers = #tpu.dot_dimension_numbers<[1], [0], [0], [1], [0, 0, 1, 1], [], []>} : vector<2x32xbf16>, vector<32x32xbf16>, vector<2x32xf32> -> vector<2x32xf32>
    %229 = arith.addf %225, %228 : vector<2x32xf32>
    %230 = vector.extract_strided_slice %5 {offsets = [3, 0, 0], sizes = [1, 1, 32], strides = [1, 1, 1]} : vector<4x1x32xf32> to vector<1x1x32xf32>
    %231 = vector.shape_cast %230 : vector<1x1x32xf32> to vector<1x32xf32>
    %232 = vector.broadcast %231 : vector<1x32xf32> to vector<2x32xf32>
    %233 = arith.addf %229, %232 : vector<2x32xf32>
    %234 = arith.negf %233 : vector<2x32xf32>
    %235 = math.exp %234 : vector<2x32xf32>
    %cst_63 = arith.constant 1.000000e+00 : f32
    %236 = vector.broadcast %cst_63 : f32 to vector<2x32xf32>
    %237 = arith.addf %236, %235 : vector<2x32xf32>
    %238 = arith.divf %236, %237 : vector<2x32xf32>
    %239 = arith.mulf %210, %171 : vector<2x32xf32>
    %240 = arith.mulf %194, %222 : vector<2x32xf32>
    %241 = arith.addf %239, %240 : vector<2x32xf32>
    %242 = math.tanh %241 : vector<2x32xf32>
    %243 = arith.mulf %238, %242 : vector<2x32xf32>
    %244 = vector.broadcast %175 : vector<2x1xf32> to vector<2x32xf32>
    %245 = arith.mulf %244, %243 : vector<2x32xf32>
    %246 = vector.broadcast %177 : vector<2x1xf32> to vector<2x32xf32>
    %247 = arith.mulf %246, %166 : vector<2x32xf32>
    %248 = arith.addf %245, %247 : vector<2x32xf32>
    %249 = vector.broadcast %175 : vector<2x1xf32> to vector<2x32xf32>
    %250 = arith.mulf %249, %241 : vector<2x32xf32>
    %251 = vector.broadcast %177 : vector<2x1xf32> to vector<2x32xf32>
    %252 = arith.mulf %251, %171 : vector<2x32xf32>
    %253 = arith.addf %250, %252 : vector<2x32xf32>
    %c3 = arith.constant 3 : index
    %c0_64 = arith.constant 0 : index
    %c0_65 = arith.constant 0 : index
    %254 = vector.load %arg1[%c3, %c0_64, %c0_65] : memref<4x2x16xbf16, #tpu.memory_space<vmem>>, vector<1x2x16xbf16>
    %255 = vector.shape_cast %254 : vector<1x2x16xbf16> to vector<2x16xbf16>
    %c3_66 = arith.constant 3 : index
    %c0_67 = arith.constant 0 : index
    %c0_68 = arith.constant 0 : index
    %256 = vector.load %arg2[%c3_66, %c0_67, %c0_68] : memref<4x2x1xf32, #tpu.memory_space<vmem>>, vector<1x2x1xf32>
    %257 = vector.shape_cast %256 : vector<1x2x1xf32> to vector<2x1xf32>
    %cst_69 = arith.constant 1.000000e+00 : f32
    %258 = vector.broadcast %cst_69 : f32 to vector<2x1xf32>
    %259 = arith.subf %258, %257 : vector<2x1xf32>
    %260 = arith.truncf %248 : vector<2x32xf32> to vector<2x32xbf16>
    %261 = vector.extract_strided_slice %3 {offsets = [0, 0, 0], sizes = [1, 16, 32], strides = [1, 1, 1]} : vector<4x16x32xbf16> to vector<1x16x32xbf16>
    %262 = vector.shape_cast %261 : vector<1x16x32xbf16> to vector<16x32xbf16>
    %cst_70 = arith.constant dense<0.000000e+00> : vector<2x32xf32>
    %263 = tpu.matmul %255, %262, %cst_70 {dimension_numbers = #tpu.dot_dimension_numbers<[1], [0], [0], [1], [0, 0, 1, 1], [], []>} : vector<2x16xbf16>, vector<16x32xbf16>, vector<2x32xf32> -> vector<2x32xf32>
    %264 = vector.extract_strided_slice %4 {offsets = [0, 0, 0], sizes = [1, 32, 32], strides = [1, 1, 1]} : vector<4x32x32xbf16> to vector<1x32x32xbf16>
    %265 = vector.shape_cast %264 : vector<1x32x32xbf16> to vector<32x32xbf16>
    %cst_71 = arith.constant dense<0.000000e+00> : vector<2x32xf32>
    %266 = tpu.matmul %260, %265, %cst_71 {dimension_numbers = #tpu.dot_dimension_numbers<[1], [0], [0], [1], [0, 0, 1, 1], [], []>} : vector<2x32xbf16>, vector<32x32xbf16>, vector<2x32xf32> -> vector<2x32xf32>
    %267 = arith.addf %263, %266 : vector<2x32xf32>
    %268 = vector.extract_strided_slice %5 {offsets = [0, 0, 0], sizes = [1, 1, 32], strides = [1, 1, 1]} : vector<4x1x32xf32> to vector<1x1x32xf32>
    %269 = vector.shape_cast %268 : vector<1x1x32xf32> to vector<1x32xf32>
    %270 = vector.broadcast %269 : vector<1x32xf32> to vector<2x32xf32>
    %271 = arith.addf %267, %270 : vector<2x32xf32>
    %272 = arith.negf %271 : vector<2x32xf32>
    %273 = math.exp %272 : vector<2x32xf32>
    %cst_72 = arith.constant 1.000000e+00 : f32
    %274 = vector.broadcast %cst_72 : f32 to vector<2x32xf32>
    %275 = arith.addf %274, %273 : vector<2x32xf32>
    %276 = arith.divf %274, %275 : vector<2x32xf32>
    %277 = vector.extract_strided_slice %3 {offsets = [1, 0, 0], sizes = [1, 16, 32], strides = [1, 1, 1]} : vector<4x16x32xbf16> to vector<1x16x32xbf16>
    %278 = vector.shape_cast %277 : vector<1x16x32xbf16> to vector<16x32xbf16>
    %cst_73 = arith.constant dense<0.000000e+00> : vector<2x32xf32>
    %279 = tpu.matmul %255, %278, %cst_73 {dimension_numbers = #tpu.dot_dimension_numbers<[1], [0], [0], [1], [0, 0, 1, 1], [], []>} : vector<2x16xbf16>, vector<16x32xbf16>, vector<2x32xf32> -> vector<2x32xf32>
    %280 = vector.extract_strided_slice %4 {offsets = [1, 0, 0], sizes = [1, 32, 32], strides = [1, 1, 1]} : vector<4x32x32xbf16> to vector<1x32x32xbf16>
    %281 = vector.shape_cast %280 : vector<1x32x32xbf16> to vector<32x32xbf16>
    %cst_74 = arith.constant dense<0.000000e+00> : vector<2x32xf32>
    %282 = tpu.matmul %260, %281, %cst_74 {dimension_numbers = #tpu.dot_dimension_numbers<[1], [0], [0], [1], [0, 0, 1, 1], [], []>} : vector<2x32xbf16>, vector<32x32xbf16>, vector<2x32xf32> -> vector<2x32xf32>
    %283 = arith.addf %279, %282 : vector<2x32xf32>
    %284 = vector.extract_strided_slice %5 {offsets = [1, 0, 0], sizes = [1, 1, 32], strides = [1, 1, 1]} : vector<4x1x32xf32> to vector<1x1x32xf32>
    %285 = vector.shape_cast %284 : vector<1x1x32xf32> to vector<1x32xf32>
    %286 = vector.broadcast %285 : vector<1x32xf32> to vector<2x32xf32>
    %287 = arith.addf %283, %286 : vector<2x32xf32>
    %288 = arith.negf %287 : vector<2x32xf32>
    %289 = math.exp %288 : vector<2x32xf32>
    %cst_75 = arith.constant 1.000000e+00 : f32
    %290 = vector.broadcast %cst_75 : f32 to vector<2x32xf32>
    %291 = arith.addf %290, %289 : vector<2x32xf32>
    %292 = arith.divf %290, %291 : vector<2x32xf32>
    %293 = vector.extract_strided_slice %3 {offsets = [2, 0, 0], sizes = [1, 16, 32], strides = [1, 1, 1]} : vector<4x16x32xbf16> to vector<1x16x32xbf16>
    %294 = vector.shape_cast %293 : vector<1x16x32xbf16> to vector<16x32xbf16>
    %cst_76 = arith.constant dense<0.000000e+00> : vector<2x32xf32>
    %295 = tpu.matmul %255, %294, %cst_76 {dimension_numbers = #tpu.dot_dimension_numbers<[1], [0], [0], [1], [0, 0, 1, 1], [], []>} : vector<2x16xbf16>, vector<16x32xbf16>, vector<2x32xf32> -> vector<2x32xf32>
    %296 = vector.extract_strided_slice %4 {offsets = [2, 0, 0], sizes = [1, 32, 32], strides = [1, 1, 1]} : vector<4x32x32xbf16> to vector<1x32x32xbf16>
    %297 = vector.shape_cast %296 : vector<1x32x32xbf16> to vector<32x32xbf16>
    %cst_77 = arith.constant dense<0.000000e+00> : vector<2x32xf32>
    %298 = tpu.matmul %260, %297, %cst_77 {dimension_numbers = #tpu.dot_dimension_numbers<[1], [0], [0], [1], [0, 0, 1, 1], [], []>} : vector<2x32xbf16>, vector<32x32xbf16>, vector<2x32xf32> -> vector<2x32xf32>
    %299 = arith.addf %295, %298 : vector<2x32xf32>
    %300 = vector.extract_strided_slice %5 {offsets = [2, 0, 0], sizes = [1, 1, 32], strides = [1, 1, 1]} : vector<4x1x32xf32> to vector<1x1x32xf32>
    %301 = vector.shape_cast %300 : vector<1x1x32xf32> to vector<1x32xf32>
    %302 = vector.broadcast %301 : vector<1x32xf32> to vector<2x32xf32>
    %303 = arith.addf %299, %302 : vector<2x32xf32>
    %304 = math.tanh %303 : vector<2x32xf32>
    %305 = vector.extract_strided_slice %3 {offsets = [3, 0, 0], sizes = [1, 16, 32], strides = [1, 1, 1]} : vector<4x16x32xbf16> to vector<1x16x32xbf16>
    %306 = vector.shape_cast %305 : vector<1x16x32xbf16> to vector<16x32xbf16>
    %cst_78 = arith.constant dense<0.000000e+00> : vector<2x32xf32>
    %307 = tpu.matmul %255, %306, %cst_78 {dimension_numbers = #tpu.dot_dimension_numbers<[1], [0], [0], [1], [0, 0, 1, 1], [], []>} : vector<2x16xbf16>, vector<16x32xbf16>, vector<2x32xf32> -> vector<2x32xf32>
    %308 = vector.extract_strided_slice %4 {offsets = [3, 0, 0], sizes = [1, 32, 32], strides = [1, 1, 1]} : vector<4x32x32xbf16> to vector<1x32x32xbf16>
    %309 = vector.shape_cast %308 : vector<1x32x32xbf16> to vector<32x32xbf16>
    %cst_79 = arith.constant dense<0.000000e+00> : vector<2x32xf32>
    %310 = tpu.matmul %260, %309, %cst_79 {dimension_numbers = #tpu.dot_dimension_numbers<[1], [0], [0], [1], [0, 0, 1, 1], [], []>} : vector<2x32xbf16>, vector<32x32xbf16>, vector<2x32xf32> -> vector<2x32xf32>
    %311 = arith.addf %307, %310 : vector<2x32xf32>
    %312 = vector.extract_strided_slice %5 {offsets = [3, 0, 0], sizes = [1, 1, 32], strides = [1, 1, 1]} : vector<4x1x32xf32> to vector<1x1x32xf32>
    %313 = vector.shape_cast %312 : vector<1x1x32xf32> to vector<1x32xf32>
    %314 = vector.broadcast %313 : vector<1x32xf32> to vector<2x32xf32>
    %315 = arith.addf %311, %314 : vector<2x32xf32>
    %316 = arith.negf %315 : vector<2x32xf32>
    %317 = math.exp %316 : vector<2x32xf32>
    %cst_80 = arith.constant 1.000000e+00 : f32
    %318 = vector.broadcast %cst_80 : f32 to vector<2x32xf32>
    %319 = arith.addf %318, %317 : vector<2x32xf32>
    %320 = arith.divf %318, %319 : vector<2x32xf32>
    %321 = arith.mulf %292, %253 : vector<2x32xf32>
    %322 = arith.mulf %276, %304 : vector<2x32xf32>
    %323 = arith.addf %321, %322 : vector<2x32xf32>
    %324 = math.tanh %323 : vector<2x32xf32>
    %325 = arith.mulf %320, %324 : vector<2x32xf32>
    %326 = vector.broadcast %257 : vector<2x1xf32> to vector<2x32xf32>
    %327 = arith.mulf %326, %325 : vector<2x32xf32>
    %328 = vector.broadcast %259 : vector<2x1xf32> to vector<2x32xf32>
    %329 = arith.mulf %328, %248 : vector<2x32xf32>
    %330 = arith.addf %327, %329 : vector<2x32xf32>
    %331 = vector.broadcast %257 : vector<2x1xf32> to vector<2x32xf32>
    %332 = arith.mulf %331, %323 : vector<2x32xf32>
    %333 = vector.broadcast %259 : vector<2x1xf32> to vector<2x32xf32>
    %334 = arith.mulf %333, %253 : vector<2x32xf32>
    %335 = arith.addf %332, %334 : vector<2x32xf32>
    %c0_81 = arith.constant 0 : index
    %c0_82 = arith.constant 0 : index
    %336 = vector.load %arg6[%c0_81, %c0_82] : memref<2x32xf32, #tpu.memory_space<vmem>>, vector<2x32xf32>
    tpu.vector_store %arg6[%c0_81, %c0_82], %330 {strides = array<i32>} : memref<2x32xf32, #tpu.memory_space<vmem>>, vector<2x32xf32>,
    %c0_83 = arith.constant 0 : index
    %c0_84 = arith.constant 0 : index
    %337 = vector.load %arg7[%c0_83, %c0_84] : memref<2x32xf32, #tpu.memory_space<vmem>>, vector<2x32xf32>
    tpu.vector_store %arg7[%c0_83, %c0_84], %335 {strides = array<i32>} : memref<2x32xf32, #tpu.memory_space<vmem>>, vector<2x32xf32>,
    return
  }
  func.func @transform_0(%arg0: i32) -> (i32, i32, i32) {
    %c0_i32 = arith.constant 0 : i32
    %c0_i32_0 = arith.constant 0 : i32
    %c0_i32_1 = arith.constant 0 : i32
    return %arg0, %c0_i32, %c0_i32_0 : i32, i32, i32
  }
  func.func @transform_1(%arg0: i32) -> (i32, i32, i32) {
    %c0_i32 = arith.constant 0 : i32
    %c0_i32_0 = arith.constant 0 : i32
    %c0_i32_1 = arith.constant 0 : i32
    return %arg0, %c0_i32, %c0_i32_0 : i32, i32, i32
  }
  func.func @transform_2(%arg0: i32) -> (i32, i32, i32) {
    %c0_i32 = arith.constant 0 : i32
    %c0_i32_0 = arith.constant 0 : i32
    %c0_i32_1 = arith.constant 0 : i32
    %c0_i32_2 = arith.constant 0 : i32
    return %c0_i32, %c0_i32_0, %c0_i32_1 : i32, i32, i32
  }
  func.func @transform_3(%arg0: i32) -> (i32, i32, i32) {
    %c0_i32 = arith.constant 0 : i32
    %c0_i32_0 = arith.constant 0 : i32
    %c0_i32_1 = arith.constant 0 : i32
    %c0_i32_2 = arith.constant 0 : i32
    return %c0_i32, %c0_i32_0, %c0_i32_1 : i32, i32, i32
  }
  func.func @transform_4(%arg0: i32) -> (i32, i32, i32) {
    %c0_i32 = arith.constant 0 : i32
    %c0_i32_0 = arith.constant 0 : i32
    %c0_i32_1 = arith.constant 0 : i32
    %c0_i32_2 = arith.constant 0 : i32
    return %c0_i32, %c0_i32_0, %c0_i32_1 : i32, i32, i32
  }
  func.func @transform_5(%arg0: i32) -> (i32, i32) {
    %c0_i32 = arith.constant 0 : i32
    %c0_i32_0 = arith.constant 0 : i32
    %c0_i32_1 = arith.constant 0 : i32
    return %c0_i32, %c0_i32_0 : i32, i32
  }
}

</mosaic_0001>

<bundles_post_ra>
// kernel: tpu_custom_call.1
= control target key start
LH: loop header
LB: loop body
LE: loop exit
PB: predicated region body
PF: predicated region fallthrough
CT: control target
= control target key end

     0   :  { %10 = vsyncpa [#allocation4], 0  ;;  %s1902_s0 = inlined_call_operand.vmem [shape: bf16[8,2,16], index: 0, kind: input, shape index: {}]   ;;  %s1903_s1 = inlined_call_operand.vmem [shape: f32[8,2,1], index: 1, kind: input, shape index: {}]   ;;  %s1904_s2 = inlined_call_operand.hbm [shape: bf16[4,16,32], index: 2, kind: input, shape index: {}]   ;;  %s1905_s3 = inlined_call_operand.hbm [shape: bf16[4,32,32], index: 3, kind: input, shape index: {}]   ;;  %s1906_s4 = inlined_call_operand.vmem [shape: f32[4,1,32], index: 4, kind: input, shape index: {}]   ;;  %s1907_s5 = inlined_call_operand.hbm [shape: f32[2,32], index: 5, kind: output, shape index: {}]  }
   0x1   :  { %11 = vsyncpa [#allocation7], 0 }
   0x2   :  { %12 = vsyncpa [#allocation5], 0  ;;  %s1648_s18 = smov 0  }
   0x3 LB: > { %s170_s21 = sshll.u32 %s1904_s2, 4  ;;  %s1657_s22 = sadd.s32 4294967295, %s1609_s18   ;;  %s1609_s18 = sphi %s1648_s18, %s18_s18   ;;  %s171_s21 = int_to_ptr.hbm [resolvable:$true] %s170_s21 }
   0x4   : > { %p1267_p0 = scmp.ge.s32.totalorder %s1609_s18, 1  ;;  %p159_p1 = scmp.lt.s32.totalorder %s1609_s18, 3 }
   0x5   : > { %p1268_p2 = scmp.ne.s32.totalorder %s1657_s22, 0  ;;  %p1411_p3 = scmp.eq.s32.totalorder %s1657_s22, 0 }
   0x6   : > { %p1663_p4 = pnand %p1267_p0, %p159_p1  ;;  %s1611_s24 = smov [#allocation3]  }
   0x7   : > { %s172_s25 = sshll.u32 %s1611_s24, 4  ;;  %s184_s28 = sshll.u32 %s1905_s3, 4  ;;  %s173_s25 = int_to_ptr.vmem [resolvable:$true] %s172_s25  ;;  %s185_s28 = int_to_ptr.hbm [resolvable:$true] %s184_s28 }
   0x8   : > { %p1404_p5 = pneg %p1663_p4  ;;  %s1612_s29 = smov [#allocation6]  }
   0x9   : > { %s186_s30 = sshll.u32 %s1612_s29, 4  ;;  %s1613_s6 = smov 64   ;;  %s187_s30 = int_to_ptr.vmem [resolvable:$true] %s186_s30 }
   0xa   : > { %p1405_p6 = pnand %p1411_p3, %p1404_p5  ;;  %s1614_s7 = smov 4  }
   0xb   : > { %222 = sbr.rel (%p1663_p4) target bundleno = 774 (0x306), region = 40 }
   0xc   : > { %1407 = dma.hbm_to_vmem [thread:$0]  (!%p1405_p6), %s171_s21, 512, %s173_s25, [#allocation4], %s1613_s6, %s1613_s6, %s1614_s7  }
   0xd   : > { %1410 = dma.hbm_to_vmem [thread:$0]  (!%p1405_p6), %s185_s28, 1024, %s187_s30, [#allocation7], %s1613_s6, %s1613_s6, %s1614_s7  }
  0x10   : > { %1596 = dma.done.wait (%p1411_p3), [#allocation4], 512  }
  0x11   : > { %1598 = vsyncadd (%p1411_p3), [#allocation4], 4294966784 }
  0x12   : > { %1600 = dma.done.wait (%p1411_p3), [#allocation7], 1024  }
  0x13   : > { %1602 = vsyncadd (%p1411_p3), [#allocation7], 4294966272  ;;  %s1274_s8 = sshll.u32 %s1657_s22, 2 }
  0x14   : > { %p256_p7 = scmp.lt.s32.totalorder %s1274_s8, 7  ;;  %270 = sbr.rel (%p1268_p2) target bundleno = 28 (0x1c), region = 52 }
  0x16   : > { %s1912_s8 = smov (!%p256_p7, %s1274_s8), 7 }
  0x17   : > { %s1688_s11 = scalar_lea.vmem %s1902_s0, %s1912_s8  ;;  %s1276_s12 = sshll.u32 %s1912_s8, 1 }
  0x18   : > { %s1693_s15 = scalar_lea.vmem %s1903_s1, %s1276_s12 }
  0x19   : > { %vm271_vm0 = vcmask 254976   ;;  %v1615_v0 = vmov 0.0  }
  0x1a   : > { %272 = vst.msk [vmem:[#allocation8] sm:$0x3] %vm271_vm0, %v1615_v0 }
  0x1b   : > { %273 = vst.msk [vmem:[#allocation2] sm:$0x3] %vm271_vm0, %v1615_v0 }
  0x1c PF: > { %v1697_v1 = vld [vmem:[#allocation6 + $0x8] sm:$0xff]  ;;  %v1699_v2 = vld [vmem:[#allocation6 + $0x18] sm:$0xff]  ;;  %v1703_v4 = vld [vmem:[#allocation3] sm:$0xff]  ;;  %v1616_v5 = vmov 0   ;;  %vm343_vm1 = vcmask 130048   ;;  %vm320_vm2 = vcmask 261120  }
  0x1d   : > { %v1701_v3 = vld [vmem:[#allocation3 + $0x8] sm:$0xff]  ;;  %1432 = vset.pattern.permute.xlu0 %v1616_v5  ;;  %1433 = vset.pattern.permute.xlu1 %v1616_v5  ;;  %v1707_v6 = vld [vmem:[#allocation6] sm:$0xff]  ;;  %v1709_v7 = vld [vmem:[#allocation6 + $0x10] sm:$0xff]  ;;  %s1617_s26 = smov [#allocation8]   ;;  %s1195_s30 = sshll.u32 %s1907_s5, 4  ;;  %s1196_s30 = int_to_ptr.hbm [resolvable:$true] %s1195_s30 }
  0x1e   : > { %330 = vmatpush.bf16.msra.mxu0 %v1697_v1  ;;  %401 = vmatpush.bf16.msra.mxu2 %v1699_v2  ;;  %v304_v9 = vld [vmem:[%s1688_s11] sm:$0x1]  ;;  %v1716_v10 = vld [vmem:[#allocation3 + $0x10] sm:$0xff]  ;;  %v1728_v15 = vld [vmem:[#allocation6 + $0x28] sm:$0xff]  ;;  %s1193_s27 = sshll.u32 %s1617_s26, 4  ;;  %p1415_p8 = scmp.eq.s32.totalorder %s1657_s22, 1  ;;  %s1194_s27 = int_to_ptr.vmem [resolvable:$true] %s1193_s27 }
  0x1f   : > { %421 = vmatpush.bf16.msra.mxu3 %v1701_v3  ;;  %354 = vmatpush.bf16.msra.mxu1 %v1703_v4  ;;  %v1718_v11 = vld [vmem:[#allocation3 + $0x18] sm:$0xff]  ;;  %v1338_v16 = vld [vmem:[%s1693_s15 + $0x2] sm:$0x3]  ;;  %v1735_v17 = vld [vmem:[#allocation6 + $0x30] sm:$0xff] }
  0x20   : > { %v1720_v12 = vld [vmem:[#allocation6 + $0x38] sm:$0xff]  ;;  %1434 = vset.pattern.permute.xlu2 %v1616_v5  ;;  %v1740_v19 = vld [vmem:[#allocation6 + $0x20] sm:$0xff]  ;;  %772 = vperm.xlu1 %1433, %v1338_v16   ;;  %v591_v20 = vsub.f32 1.0, %v1338_v16 }
  0x21   : > { %v1711_v8 = vld [vmem:[#allocation8] sm:$0x3]  ;;  %v305_v13 = vld [vmem:[%s1693_s15] sm:$0x3]  ;;  %v1364_v21 = vld [vmem:[%s1693_s15 + $0x6] sm:$0x3] }
  0x22   : > { %v307_v14 = vpack.c.bf16 %v1711_v8, %v1711_v8  ;;  %573 = vperm.xlu0 %1432, %v305_v13   ;;  %331 = vmatpush.bf16.msra.mxu0 %v1707_v6  ;;  %v306_v18 = vsub.f32 1.0, %v305_v13  ;;  %v989_v22 = vsub.f32 1.0, %v1364_v21  ;;  %v1764_v24 = vld [vmem:[%s1906_s4] ss:$0 sm:$0xff]  ;;  %v1770_v30 = vld [vmem:[%s1906_s4 + $0x1] ss:$0 sm:$0xff] }
  0x23   : > { %488 = vmatpush.bf16.msrb.mxu3 %v1716_v10  ;;  %402 = vmatpush.bf16.msra.mxu2 %v1709_v7  ;;  %v1337_v43 = vld [vmem:[%s1688_s11 + $0x1] sm:$0x1]  ;;  %v1781_v47 = vld [vmem:[%s1906_s4 + $0x3] ss:$0 sm:$0xff]  ;;  %v1786_v50 = vld [vmem:[%s1906_s4 + $0x2] ss:$0 sm:$0xff] }
  0x24   : > { %1306 = vmatmul.msk.bf16.vlgmr.msra.gmra.mxu3 %vm343_vm1, %v304_v9  ;;  %1291 = vmatmul.msk.bf16.vlgmr.msra.gmra.mxu1 %vm343_vm1, %v304_v9 }
  0x25   : > { %1286 = vmatmul.msk.bf16.vlgmr.msra.gmra.mxu0 %vm320_vm2, %v307_v14  ;;  %468 = vmatpush.bf16.msrb.mxu1 %v1728_v15 }
  0x26   : > { %517 = vmatpush.bf16.msrb.mxu0 %v1720_v12  ;;  %1301 = vmatmul.msk.bf16.vlgmr.msra.gmra.mxu2 %vm320_vm2, %v307_v14 }
  0x27   : > { %537 = vmatpush.bf16.msrb.mxu2 %v1718_v11  ;;  %619 = vmatpush.bf16.msra.mxu3 %v1703_v4 }
  0x28   : > { %778 = vperm.xlu1 %1433, %v591_v20  }
  0x29   : > { %469 = vmatpush.bf16.msrb.mxu1 %v1740_v19 }
  0x2a   : > { %518 = vmatpush.bf16.msrb.mxu0 %v1735_v17  ;;  %579 = vperm.xlu0 %1432, %v306_v18  }
  0x2b   : > { %665 = vmatpush.bf16.msra.mxu2 %v1701_v3 }
  0x2d   : > { %602 = vmatpush.bf16.msra.mxu1 %v1697_v1 }
  0x2e   : > { %651 = vmatpush.bf16.msra.mxu0 %v1699_v2 }
  0x30   : > { %1176 = vperm.xlu1 %1433, %v989_v22  }
  0x31   : > { %603 = vmatpush.bf16.msra.mxu1 %v1707_v6 }
  0x32   : > { %652 = vmatpush.bf16.msra.mxu0 %v1709_v7  ;;  %1170 = vperm.xlu0 %1432, %v1364_v21  }
  0x34   : > { %1321 = vmatmul.msk.bf16.vlgmr.msrb.gmra.mxu3 %vm343_vm1, %v304_v9  ;;  %1316 = vmatmul.msk.bf16.vlgmr.msrb.gmra.mxu1 %vm320_vm2, %v307_v14 }
  0x35   : > { %711 = vmatpush.bf16.msrb.mxu3 %v1716_v10  ;;  %697 = vmatpush.bf16.msrb.mxu1 %v1728_v15 }
  0x36   : > { %1330 = vmatmul.msk.bf16.vlgmr.msrb.gmra.mxu0 %vm320_vm2, %v307_v14  ;;  %1335 = vmatmul.msk.bf16.vlgmr.msrb.gmra.mxu2 %vm343_vm1, %v304_v9 }
  0x37   : > { %739 = vmatpush.bf16.msrb.mxu2 %v1718_v11  ;;  %725 = vmatpush.bf16.msrb.mxu0 %v1720_v12 }
  0x39   : > { %698 = vmatpush.bf16.msrb.mxu1 %v1740_v19 }
  0x3b   : > { %726 = vmatpush.bf16.msrb.mxu0 %v1735_v17 }
  0x44   : > { %1340 = vmatmul.msk.bf16.vlgmr.msra.gmra.mxu3 %vm343_vm1, %v1337_v43 }
  0x45   : > { %818 = vmatpush.bf16.msra.mxu3 %v1703_v4 }
  0x46   : > { %1343 = vmatmul.msk.bf16.vlgmr.msra.gmra.mxu2 %vm343_vm1, %v1337_v43 }
  0x47   : > { %864 = vmatpush.bf16.msra.mxu2 %v1701_v3 }
  0x54   : > { %1346 = vmatmul.msk.bf16.vlgmr.msrb.gmra.mxu3 %vm343_vm1, %v1337_v43 }
  0x55   : > { %910 = vmatpush.bf16.msrb.mxu3 %v1716_v10 }
  0x56   : > { %1348 = vmatmul.msk.bf16.vlgmr.msrb.gmra.mxu2 %vm343_vm1, %v1337_v43 }
  0x57   : > { %938 = vmatpush.bf16.msrb.mxu2 %v1718_v11 }
  0x94   : > { %v574_v9 = vpop.permute.xlu0 %573 }
  0xa1   : > { %v356_v23 = vpop.f32.mrf.mxu1 }
  0xa2   : > { %v333_v25 = vpop.f32.mrf.mxu0 }
  0xa3   : > { %v357_v26 = vadd.f32 %v356_v23, %v333_v25 }
  0xa5   : > { %v363_v27 = vadd.f32 %v1764_v24, %v357_v26 }
  0xa7   : > { %v423_v28 = vpop.f32.mrf.mxu3  ;;  %v1292_v29 = vmul.f32 -1.442695, %v363_v27 }
  0xa9   : > { %v404_v31 = vpop.f32.mrf.mxu2  ;;  %v358_v32 = vpop.f32.mrf.mxu1  ;;  %1439 = vpow2.f32 %v1292_v29 }
  0xaa   : > { %v424_v33 = vadd.f32 %v423_v28, %v404_v31  ;;  %v335_v34 = vpop.f32.mrf.mxu0  ;;  %v303_v31 = vld [vmem:[#allocation2] sm:$0x3] }
  0xac   : > { %v430_v35 = vadd.f32 %v1770_v30, %v424_v33 }
  0xae   : > { %v1307_v36 = vmul.f32 -1.442695, %v430_v35 }
  0xaf   : > { %v425_v37 = vpop.f32.mrf.mxu3  ;;  %v1440_v38 = vpop.eup %1439 }
  0xb0   : > { %1441 = vpow2.f32 %v1307_v36  ;;  %v367_v39 = vadd.f32 1.0, %v1440_v38  ;;  %v580_v38 = vpop.permute.xlu0 %579 }
  0xb1   : > { %v406_v40 = vpop.f32.mrf.mxu2  ;;  %v471_v41 = vpop.f32.mrf.mxu1 }
  0xb2   : > { %1443 = vrcp.f32 %v367_v39  ;;  %vm373_vm3 = vweird.f32 %v367_v39  ;;  %v379_v13 = vand.u32 2147483648, %v367_v39  ;;  %v377_v14 = vand.u32 2147483647, %v367_v39 }
  0xb3   : > { %v520_v42 = vpop.f32.mrf.mxu0  ;;  %v585_v40 = vmul.f32 %v580_v38, %v303_v31 }
  0xb4   : > { %v380_v25 = vor.u32 1.1754944e-38, %v379_v13  ;;  %vm378_vm7 = vcmp.eq.f32.partialorder %v377_v14, 8.507059e+37 }
  0xb6   : > { %v1442_v44 = vpop.eup %1441 }
  0xb7   : > { %v434_v45 = vadd.f32 1.0, %v1442_v44  ;;  %v490_v46 = vpop.f32.mrf.mxu3 }
  0xb8   : > { %v1444_v48 = vpop.eup %1443  ;;  %v491_v49 = vadd.f32 %v490_v46, %v471_v41  ;;  %v1351_v46 = vld [vmem:[%s1693_s15 + $0x4] sm:$0x3] }
  0xb9   : > { %1445 = vrcp.f32 %v434_v45  ;;  %v539_v51 = vpop.f32.mrf.mxu2  ;;  %v473_v52 = vpop.f32.mrf.mxu1  ;;  %v369_v53 = vmul.f32 %v1444_v48, %v367_v39  ;;  %vm374_vm4 = vweird.f32 %v1444_v48  ;;  %v446_v20 = vand.u32 2147483648, %v434_v45  ;;  %971 = vperm.xlu2 %1434, %v1351_v46  }
  0xba   : > { %v540_v54 = vadd.f32 %v539_v51, %v520_v42  ;;  %v497_v58 = vadd.f32 %v1786_v50, %v491_v49  ;;  %vm1790_vm5 = vmor %vm373_vm3, %vm374_vm4  ;;  %v444_v23 = vand.u32 2147483647, %v434_v45  ;;  %vm440_vm8 = vweird.f32 %v434_v45 }
  0xbb   : > { %v522_v55 = vpop.f32.mrf.mxu0  ;;  %v370_v57 = vsub.f32 1.0, %v369_v53  ;;  %v447_v33 = vor.u32 1.1754944e-38, %v446_v20 }
  0xbc   : > { %v546_v56 = vadd.f32 %v1781_v47, %v540_v54  ;;  %vm445_vm10 = vcmp.eq.f32.partialorder %v444_v23, 8.507059e+37  ;;  %v790_v54 = vsub.f32 1.0, %v1351_v46 }
  0xbd   : > { %v371_v60 = vmul.f32 %v1444_v48, %v370_v57 }
  0xbe   : > { %v1336_v59 = vmul.f32 -1.442695, %v546_v56 }
  0xbf   : > { %v1446_v61 = vpop.eup %1445  ;;  %v492_v62 = vpop.f32.mrf.mxu3  ;;  %v372_v0 = vadd.f32 %v1444_v48, %v371_v60  ;;  %v582_v60 = vmul.f32 %v580_v38, %v1711_v8 }
  0xc0   : > { %v436_v63 = vmul.f32 %v1446_v61, %v434_v45  ;;  %1447 = vpow2.f32 %v1336_v59  ;;  %vm441_vm6 = vweird.f32 %v1446_v61 }
  0xc1   : > { %1449 = vtanh.f32 %v497_v58  ;;  %v541_v5 = vpop.f32.mrf.mxu2  ;;  %v376_v21 = vsel %vm1790_vm5, %v1444_v48, %v372_v0  ;;  %vm442_vm9 = vmor %vm440_vm8, %vm441_vm6  ;;  %977 = vperm.xlu2 %1434, %v790_v54  }
  0xc2   : > { %v437_v16 = vsub.f32 1.0, %v436_v63  ;;  %v381_v32 = vsel %vm378_vm7, %v380_v25, %v376_v21 }
  0xc4   : > { %v438_v22 = vmul.f32 %v1446_v61, %v437_v16 }
  0xc6   : > { %v1448_v26 = vpop.eup %1447  ;;  %v439_v27 = vadd.f32 %v1446_v61, %v438_v22 }
  0xc7   : > { %v1450_v28 = vpop.eup %1449  ;;  %v550_v29 = vadd.f32 1.0, %v1448_v26  ;;  %v621_v63 = vpop.f32.mrf.mxu3 }
  0xc8   : > { %v443_v34 = vsel %vm442_vm9, %v1446_v61, %v439_v27  ;;  %v567_v37 = vmul.f32 %v1450_v28, %v381_v32 }
  0xc9   : > { %1451 = vrcp.f32 %v550_v29  ;;  %v448_v35 = vsel %vm445_vm10, %v447_v33, %v443_v34  ;;  %v562_v48 = vand.u32 2147483648, %v550_v29  ;;  %v560_v51 = vand.u32 2147483647, %v550_v29  ;;  %v667_v8 = vpop.f32.mrf.mxu2 }
  0xca   : > { %v566_v36 = vmul.f32 %v448_v35, %v303_v31  ;;  %vm556_vm12 = vweird.f32 %v550_v29  ;;  %v1350_v31 = vld [vmem:[%s1688_s11 + $0x2] sm:$0x1] }
  0xcb   : > { %v563_v53 = vor.u32 1.1754944e-38, %v562_v48  ;;  %vm561_vm14 = vcmp.eq.f32.partialorder %v560_v51, 8.507059e+37  ;;  %1356 = vmatmul.msk.bf16.vlgmr.msra.gmra.mxu2 %vm343_vm1, %v1350_v31  ;;  %1353 = vmatmul.msk.bf16.vlgmr.msra.gmra.mxu3 %vm343_vm1, %v1350_v31 }
  0xcc   : > { %v568_v39 = vadd.f32 %v567_v37, %v566_v36  ;;  %1063 = vmatpush.bf16.msra.mxu2 %v1701_v3  ;;  %1017 = vmatpush.bf16.msra.mxu3 %v1703_v4 }
  0xce   : > { %v584_v41 = vmul.f32 %v574_v9, %v568_v39  ;;  %1453 = vtanh.f32 %v568_v39 }
  0xcf   : > { %v1452_v42 = vpop.eup %1451  ;;  %v623_v5 = vpop.f32.mrf.mxu3 }
  0xd0   : > { %v552_v43 = vmul.f32 %v1452_v42, %v550_v29  ;;  %v1801_v44 = vadd.f32 %v585_v40, %v584_v41  ;;  %vm557_vm11 = vweird.f32 %v1452_v42 }
  0xd1   : > { %vm558_vm13 = vmor %vm556_vm12, %vm557_vm11  ;;  %v669_v0 = vpop.f32.mrf.mxu2 }
  0xd2   : > { %v553_v45 = vsub.f32 1.0, %v552_v43 }
  0xd4   : > { %v554_v49 = vmul.f32 %v1452_v42, %v553_v45  ;;  %v1454_v56 = vpop.eup %1453 }
  0xd6   : > { %v555_v52 = vadd.f32 %v1452_v42, %v554_v49 }
  0xd7   : > { %v713_v13 = vpop.f32.mrf.mxu3 }
  0xd8   : > { %v559_v55 = vsel %vm558_vm13, %v1452_v42, %v555_v52 }
  0xd9   : > { %v564_v57 = vsel %vm561_vm14, %v563_v53, %v559_v55 }
  0xda   : > { %v570_v58 = vmul.f32 %v1454_v56, %v564_v57 }
  0xdb   : > { %1361 = vmatmul.msk.bf16.vlgmr.msrb.gmra.mxu2 %vm343_vm1, %v1350_v31  ;;  %1359 = vmatmul.msk.bf16.vlgmr.msrb.gmra.mxu3 %vm343_vm1, %v1350_v31 }
  0xdc   : > { %v576_v59 = vmul.f32 %v574_v9, %v570_v58  ;;  %v741_v9 = vpop.f32.mrf.mxu2  ;;  %1137 = vmatpush.bf16.msrb.mxu2 %v1718_v11  ;;  %1109 = vmatpush.bf16.msrb.mxu3 %v1716_v10 }
  0xde   : > { %v1805_v61 = vadd.f32 %v582_v60, %v576_v59 }
  0xdf   : > { %v715_v16 = vpop.f32.mrf.mxu3 }
  0xe0   : > { %v592_v62 = vpack.c.bf16 %v1805_v61, %v1805_v61 }
  0xe2   : > { %1339 = vmatmul.msk.bf16.vlgmr.msra.gmra.mxu1 %vm320_vm2, %v592_v62  ;;  %1342 = vmatmul.msk.bf16.vlgmr.msra.gmra.mxu0 %vm320_vm2, %v592_v62 }
  0xe3   : > { %850 = vmatpush.bf16.msra.mxu0 %v1699_v2  ;;  %801 = vmatpush.bf16.msra.mxu1 %v1697_v1 }
  0xe4   : > { %v743_v14 = vpop.f32.mrf.mxu2 }
  0xe7   : > { %851 = vmatpush.bf16.msra.mxu0 %v1709_v7  ;;  %802 = vmatpush.bf16.msra.mxu1 %v1707_v6 }
  0xf2   : > { %1345 = vmatmul.msk.bf16.vlgmr.msrb.gmra.mxu1 %vm320_vm2, %v592_v62  ;;  %1347 = vmatmul.msk.bf16.vlgmr.msrb.gmra.mxu0 %vm320_vm2, %v592_v62 }
  0xf3   : > { %924 = vmatpush.bf16.msrb.mxu0 %v1720_v12  ;;  %896 = vmatpush.bf16.msrb.mxu1 %v1728_v15 }
  0xf7   : > { %925 = vmatpush.bf16.msrb.mxu0 %v1735_v17  ;;  %897 = vmatpush.bf16.msrb.mxu1 %v1740_v19 }
 0x15f   : > { %v605_v18 = vpop.f32.mrf.mxu1  ;;  %v654_v20 = vpop.f32.mrf.mxu0 }
 0x160   : > { %v622_v21 = vadd.f32 %v621_v63, %v605_v18  ;;  %v668_v22 = vadd.f32 %v667_v8, %v654_v20 }
 0x162   : > { %v625_v23 = vadd.f32 %v1764_v24, %v622_v21  ;;  %v671_v25 = vadd.f32 %v1770_v30, %v668_v22  ;;  %v1838_v22 = vpop.permute.xlu1 %772 }
 0x164   : > { %v1341_v26 = vmul.f32 -1.442695, %v625_v23  ;;  %v1344_v27 = vmul.f32 -1.442695, %v671_v25 }
 0x166   : > { %1455 = vpow2.f32 %v1341_v26 }
 0x167   : > { %1457 = vpow2.f32 %v1344_v27  ;;  %v607_v28 = vpop.f32.mrf.mxu1  ;;  %v656_v29 = vpop.f32.mrf.mxu0 }
 0x16c   : > { %v1456_v32 = vpop.eup %1455 }
 0x16d   : > { %v1458_v33 = vpop.eup %1457  ;;  %v629_v34 = vadd.f32 1.0, %v1456_v32 }
 0x16e   : > { %v675_v35 = vadd.f32 1.0, %v1458_v33 }
 0x16f   : > { %1459 = vrcp.f32 %v629_v34  ;;  %v700_v36 = vpop.f32.mrf.mxu1  ;;  %v728_v37 = vpop.f32.mrf.mxu0  ;;  %v639_v52 = vand.u32 2147483647, %v629_v34  ;;  %v641_v53 = vand.u32 2147483648, %v629_v34  ;;  %vm635_vm3 = vweird.f32 %v629_v34 }
 0x170   : > { %1461 = vrcp.f32 %v675_v35  ;;  %v742_v38 = vadd.f32 %v741_v9, %v728_v37  ;;  %v714_v39 = vadd.f32 %v713_v13, %v700_v36  ;;  %v687_v55 = vand.u32 2147483648, %v675_v35 }
 0x171   : > { %v685_v57 = vand.u32 2147483647, %v675_v35  ;;  %v642_v62 = vor.u32 1.1754944e-38, %v641_v53  ;;  %vm681_vm5 = vweird.f32 %v675_v35  ;;  %vm640_vm6 = vcmp.eq.f32.partialorder %v639_v52, 8.507059e+37 }
 0x172   : > { %v745_v40 = vadd.f32 %v1781_v47, %v742_v38  ;;  %v717_v46 = vadd.f32 %v1786_v50, %v714_v39  ;;  %v688_v0 = vor.u32 1.1754944e-38, %v687_v55 }
 0x173   : > { %vm686_vm8 = vcmp.eq.f32.partialorder %v685_v57, 8.507059e+37 }
 0x174   : > { %v1349_v41 = vmul.f32 -1.442695, %v745_v40 }
 0x175   : > { %v1460_v42 = vpop.eup %1459 }
 0x176   : > { %v1462_v43 = vpop.eup %1461  ;;  %v631_v45 = vmul.f32 %v1460_v42, %v629_v34  ;;  %1463 = vpow2.f32 %v1349_v41  ;;  %vm636_vm15 = vweird.f32 %v1460_v42  ;;  %v1841_v34 = vpop.permute.xlu1 %778 }
 0x177   : > { %v677_v48 = vmul.f32 %v1462_v43, %v675_v35  ;;  %v702_v3 = vpop.f32.mrf.mxu1  ;;  %v730_v49 = vpop.f32.mrf.mxu0  ;;  %1465 = vtanh.f32 %v717_v46  ;;  %vm682_vm0 = vweird.f32 %v1462_v43  ;;  %vm637_vm4 = vmor %vm635_vm3, %vm636_vm15  ;;  %v781_v35 = vmul.f32 %v1841_v34, %v1805_v61 }
 0x178   : > { %v632_v4 = vsub.f32 1.0, %v631_v45  ;;  %vm683_vm7 = vmor %vm681_vm5, %vm682_vm0  ;;  %v866_v61 = vpop.f32.mrf.mxu2  ;;  %v1363_v49 = vld [vmem:[%s1688_s11 + $0x3] sm:$0x1] }
 0x179   : > { %v678_v51 = vsub.f32 1.0, %v677_v48  ;;  %1369 = vmatmul.msk.bf16.vlgmr.msra.gmra.mxu2 %vm343_vm1, %v1363_v49  ;;  %1366 = vmatmul.msk.bf16.vlgmr.msra.gmra.mxu3 %vm343_vm1, %v1363_v49 }
 0x17a   : > { %v633_v54 = vmul.f32 %v1460_v42, %v632_v4 }
 0x17b   : > { %v679_v56 = vmul.f32 %v1462_v43, %v678_v51 }
 0x17c   : > { %v1464_v58 = vpop.eup %1463  ;;  %v634_v59 = vadd.f32 %v1460_v42, %v633_v54 }
 0x17d   : > { %v749_v60 = vadd.f32 1.0, %v1464_v58  ;;  %v680_v8 = vadd.f32 %v1462_v43, %v679_v56  ;;  %v1466_v13 = vpop.eup %1465 }
 0x17e   : > { %v638_v63 = vsel %vm637_vm4, %v1460_v42, %v634_v59 }
 0x17f   : > { %1467 = vrcp.f32 %v749_v60  ;;  %v643_v5 = vsel %vm640_vm6, %v642_v62, %v638_v63  ;;  %v684_v9 = vsel %vm683_vm7, %v1462_v43, %v680_v8  ;;  %v761_v23 = vand.u32 2147483648, %v749_v60 }
 0x180   : > { %v689_v14 = vsel %vm686_vm8, %v688_v0, %v684_v9  ;;  %v766_v18 = vmul.f32 %v1466_v13, %v643_v5  ;;  %v759_v26 = vand.u32 2147483647, %v749_v60  ;;  %vm755_vm10 = vweird.f32 %v749_v60  ;;  %v868_v39 = vpop.f32.mrf.mxu2  ;;  %v972_v13 = vpop.permute.xlu2 %971 }
 0x181   : > { %v765_v16 = vmul.f32 %v689_v14, %v1801_v44  ;;  %v762_v28 = vor.u32 1.1754944e-38, %v761_v23 }
 0x182   : > { %vm760_vm12 = vcmp.eq.f32.partialorder %v759_v26, 8.507059e+37 }
 0x183   : > { %v1836_v21 = vadd.f32 %v766_v18, %v765_v16 }
 0x185   : > { %v1468_v20 = vpop.eup %1467  ;;  %1469 = vtanh.f32 %v1836_v21  ;;  %v783_v23 = vmul.f32 %v1838_v22, %v1836_v21 }
 0x186   : > { %v751_v11 = vmul.f32 %v1468_v20, %v749_v60  ;;  %vm756_vm9 = vweird.f32 %v1468_v20 }
 0x187   : > { %vm757_vm11 = vmor %vm755_vm10, %vm756_vm9 }
 0x188   : > { %v752_v10 = vsub.f32 1.0, %v751_v11  ;;  %v940_v40 = vpop.f32.mrf.mxu2 }
 0x189   : > { %1374 = vmatmul.msk.bf16.vlgmr.msrb.gmra.mxu2 %vm343_vm1, %v1363_v49  ;;  %1372 = vmatmul.msk.bf16.vlgmr.msrb.gmra.mxu3 %vm343_vm1, %v1363_v49 }
 0x18a   : > { %v753_v25 = vmul.f32 %v1468_v20, %v752_v10 }
 0x18b   : > { %v1470_v31 = vpop.eup %1469 }
 0x18c   : > { %v754_v27 = vadd.f32 %v1468_v20, %v753_v25 }
 0x18e   : > { %v758_v29 = vsel %vm757_vm11, %v1468_v20, %v754_v27 }
 0x18f   : > { %v763_v32 = vsel %vm760_vm12, %v762_v28, %v758_v29  ;;  %v784_v29 = vmul.f32 %v1841_v34, %v1801_v44 }
 0x190   : > { %v769_v33 = vmul.f32 %v1470_v31, %v763_v32 }
 0x192   : > { %v775_v36 = vmul.f32 %v1838_v22, %v769_v33 }
 0x194   : > { %v1846_v37 = vadd.f32 %v781_v35, %v775_v36  ;;  %v785_v36 = vadd.f32 %v784_v29, %v783_v23 }
 0x196   : > { %v791_v38 = vpack.c.bf16 %v1846_v37, %v1846_v37 }
 0x198   : > { %1352 = vmatmul.msk.bf16.vlgmr.msra.gmra.mxu1 %vm320_vm2, %v791_v38  ;;  %1355 = vmatmul.msk.bf16.vlgmr.msra.gmra.mxu0 %vm320_vm2, %v791_v38 }
 0x199   : > { %1049 = vmatpush.bf16.msra.mxu0 %v1699_v2  ;;  %1000 = vmatpush.bf16.msra.mxu1 %v1697_v1  ;;  %v820_v2 = vpop.f32.mrf.mxu3 }
 0x19d   : > { %1050 = vmatpush.bf16.msra.mxu0 %v1709_v7  ;;  %1001 = vmatpush.bf16.msra.mxu1 %v1707_v6  ;;  %v942_v6 = vpop.f32.mrf.mxu2 }
 0x1a1   : > { %v822_v1 = vpop.f32.mrf.mxu3 }
 0x1a8   : > { %1358 = vmatmul.msk.bf16.vlgmr.msrb.gmra.mxu1 %vm320_vm2, %v791_v38  ;;  %1360 = vmatmul.msk.bf16.vlgmr.msrb.gmra.mxu0 %vm320_vm2, %v791_v38 }
 0x1a9   : > { %1123 = vmatpush.bf16.msrb.mxu0 %v1720_v12  ;;  %1095 = vmatpush.bf16.msrb.mxu1 %v1728_v15  ;;  %v912_v7 = vpop.f32.mrf.mxu3 }
 0x1ad   : > { %1124 = vmatpush.bf16.msrb.mxu0 %v1735_v17  ;;  %1096 = vmatpush.bf16.msrb.mxu1 %v1740_v19 }
 0x1b1   : > { %v914_v41 = vpop.f32.mrf.mxu3 }
 0x215   : > { %v804_v42 = vpop.f32.mrf.mxu1  ;;  %v853_v43 = vpop.f32.mrf.mxu0 }
 0x216   : > { %v821_v45 = vadd.f32 %v820_v2, %v804_v42  ;;  %v867_v46 = vadd.f32 %v866_v61, %v853_v43 }
 0x218   : > { %v824_v12 = vadd.f32 %v1764_v24, %v821_v45  ;;  %v870_v15 = vadd.f32 %v1770_v30, %v867_v46 }
 0x21a   : > { %v1354_v17 = vmul.f32 -1.442695, %v824_v12  ;;  %v1357_v48 = vmul.f32 -1.442695, %v870_v15 }
 0x21c   : > { %1471 = vpow2.f32 %v1354_v17 }
 0x21d   : > { %1473 = vpow2.f32 %v1357_v48  ;;  %v806_v19 = vpop.f32.mrf.mxu1  ;;  %v855_v3 = vpop.f32.mrf.mxu0 }
 0x222   : > { %v1472_v4 = vpop.eup %1471 }
 0x223   : > { %v1474_v51 = vpop.eup %1473  ;;  %v828_v52 = vadd.f32 1.0, %v1472_v4 }
 0x224   : > { %v874_v53 = vadd.f32 1.0, %v1474_v51 }
 0x225   : > { %1475 = vrcp.f32 %v828_v52  ;;  %v899_v54 = vpop.f32.mrf.mxu1  ;;  %v927_v55 = vpop.f32.mrf.mxu0  ;;  %v840_v18 = vand.u32 2147483648, %v828_v52  ;;  %v838_v10 = vand.u32 2147483647, %v828_v52  ;;  %vm834_vm15 = vweird.f32 %v828_v52 }
 0x226   : > { %1477 = vrcp.f32 %v874_v53  ;;  %v913_v56 = vadd.f32 %v912_v7, %v899_v54  ;;  %v941_v57 = vadd.f32 %v940_v40, %v927_v55  ;;  %v886_v20 = vand.u32 2147483648, %v874_v53  ;;  %v978_v40 = vpop.permute.xlu2 %977  ;;  %v1065_v54 = vpop.f32.mrf.mxu2 }
 0x227   : > { %v884_v26 = vand.u32 2147483647, %v874_v53  ;;  %vm880_vm0 = vweird.f32 %v874_v53  ;;  %v841_v31 = vor.u32 1.1754944e-38, %v840_v18  ;;  %vm839_vm5 = vcmp.eq.f32.partialorder %v838_v10, 8.507059e+37  ;;  %v1019_v55 = vpop.f32.mrf.mxu3 }
 0x228   : > { %v944_v58 = vadd.f32 %v1781_v47, %v941_v57  ;;  %v916_v60 = vadd.f32 %v1786_v50, %v913_v56  ;;  %v887_v33 = vor.u32 1.1754944e-38, %v886_v20  ;;  %v983_v34 = vmul.f32 %v978_v40, %v785_v36 }
 0x229   : > { %vm885_vm6 = vcmp.eq.f32.partialorder %v884_v26, 8.507059e+37  ;;  %v980_v4 = vmul.f32 %v978_v40, %v1846_v37 }
 0x22a   : > { %v1362_v62 = vmul.f32 -1.442695, %v944_v58 }
 0x22b   : > { %v1476_v59 = vpop.eup %1475 }
 0x22c   : > { %v1478_v8 = vpop.eup %1477  ;;  %v830_v63 = vmul.f32 %v1476_v59, %v828_v52  ;;  %1479 = vpow2.f32 %v1362_v62  ;;  %vm835_vm13 = vweird.f32 %v1476_v59 }
 0x22d   : > { %v876_v0 = vmul.f32 %v1478_v8, %v874_v53  ;;  %v901_v5 = vpop.f32.mrf.mxu1  ;;  %v929_v9 = vpop.f32.mrf.mxu0  ;;  %1481 = vtanh.f32 %v916_v60  ;;  %vm881_vm14 = vweird.f32 %v1478_v8  ;;  %vm836_vm3 = vmor %vm834_vm15, %vm835_vm13 }
 0x22e   : > { %v831_v14 = vsub.f32 1.0, %v830_v63  ;;  %vm882_vm4 = vmor %vm880_vm0, %vm881_vm14  ;;  %v1067_v56 = vpop.f32.mrf.mxu2 }
 0x22f   : > { %v877_v16 = vsub.f32 1.0, %v876_v0  ;;  %v1021_v57 = vpop.f32.mrf.mxu3 }
 0x230   : > { %v832_v11 = vmul.f32 %v1476_v59, %v831_v14 }
 0x231   : > { %v878_v25 = vmul.f32 %v1478_v8, %v877_v16 }
 0x232   : > { %v833_v27 = vadd.f32 %v1476_v59, %v832_v11  ;;  %v1480_v28 = vpop.eup %1479 }
 0x233   : > { %v879_v32 = vadd.f32 %v1478_v8, %v878_v25  ;;  %v948_v22 = vadd.f32 1.0, %v1480_v28  ;;  %v1482_v35 = vpop.eup %1481 }
 0x234   : > { %v837_v21 = vsel %vm836_vm3, %v1476_v59, %v833_v27  ;;  %vm1184_vm3 = vcmask 254976  }
 0x235   : > { %v842_v38 = vsel %vm839_vm5, %v841_v31, %v837_v21  ;;  %v883_v61 = vsel %vm882_vm4, %v1478_v8, %v879_v32  ;;  %1483 = vrcp.f32 %v948_v22  ;;  %v960_v45 = vand.u32 2147483648, %v948_v22 }
 0x236   : > { %v888_v2 = vsel %vm885_vm6, %v887_v33, %v883_v61  ;;  %v965_v39 = vmul.f32 %v1482_v35, %v842_v38  ;;  %v958_v12 = vand.u32 2147483647, %v948_v22  ;;  %vm954_vm7 = vweird.f32 %v948_v22  ;;  %v1139_v58 = vpop.f32.mrf.mxu2 }
 0x237   : > { %v964_v1 = vmul.f32 %v888_v2, %v785_v36  ;;  %v961_v17 = vor.u32 1.1754944e-38, %v960_v45  ;;  %v1111_v37 = vpop.f32.mrf.mxu3 }
 0x238   : > { %vm959_vm9 = vcmp.eq.f32.partialorder %v958_v12, 8.507059e+37 }
 0x239   : > { %v966_v44 = vadd.f32 %v965_v39, %v964_v1 }
 0x23b   : > { %v982_v7 = vmul.f32 %v972_v13, %v966_v44  ;;  %v1484_v6 = vpop.eup %1483  ;;  %1485 = vtanh.f32 %v966_v44 }
 0x23c   : > { %v950_v41 = vmul.f32 %v1484_v6, %v948_v22  ;;  %vm955_vm1 = vweird.f32 %v1484_v6 }
 0x23d   : > { %v1875_v42 = vadd.f32 %v983_v34, %v982_v7  ;;  %vm956_vm8 = vmor %vm954_vm7, %vm955_vm1 }
 0x23e   : > { %v951_v43 = vsub.f32 1.0, %v950_v41  ;;  %v1141_v59 = vpop.f32.mrf.mxu2 }
 0x23f   : > { %v1113_v60 = vpop.f32.mrf.mxu3 }
 0x240   : > { %v952_v46 = vmul.f32 %v1484_v6, %v951_v43 }
 0x241   : > { %v1486_v19 = vpop.eup %1485 }
 0x242   : > { %v953_v15 = vadd.f32 %v1484_v6, %v952_v46 }
 0x244   : > { %v957_v48 = vsel %vm956_vm8, %v1484_v6, %v953_v15 }
 0x245   : > { %v962_v3 = vsel %vm959_vm9, %v961_v17, %v957_v48 }
 0x246   : > { %v968_v49 = vmul.f32 %v1486_v19, %v962_v3  ;;  %v1171_v3 = vpop.permute.xlu0 %1170 }
 0x248   : > { %v974_v51 = vmul.f32 %v972_v13, %v968_v49  ;;  %v1177_v49 = vpop.permute.xlu1 %1176 }
 0x24a   : > { %v1878_v52 = vadd.f32 %v980_v4, %v974_v51  ;;  %v1182_v51 = vmul.f32 %v1177_v49, %v1875_v42 }
 0x24c   : > { %v990_v53 = vpack.c.bf16 %v1878_v52, %v1878_v52 }
 0x24e   : > { %1365 = vmatmul.msk.bf16.vlgmr.msra.gmra.mxu1 %vm320_vm2, %v990_v53  ;;  %1368 = vmatmul.msk.bf16.vlgmr.msra.gmra.mxu0 %vm320_vm2, %v990_v53 }
 0x25e   : > { %1371 = vmatmul.msk.bf16.vlgmr.msrb.gmra.mxu1 %vm320_vm2, %v990_v53  ;;  %1373 = vmatmul.msk.bf16.vlgmr.msrb.gmra.mxu0 %vm320_vm2, %v990_v53 }
 0x2cb   : > { %v1003_v62 = vpop.f32.mrf.mxu1  ;;  %v1052_v8 = vpop.f32.mrf.mxu0 }
 0x2cc   : > { %v1020_v63 = vadd.f32 %v1019_v55, %v1003_v62  ;;  %v1066_v0 = vadd.f32 %v1065_v54, %v1052_v8 }
 0x2ce   : > { %v1023_v5 = vadd.f32 %v1764_v24, %v1020_v63  ;;  %v1069_v9 = vadd.f32 %v1770_v30, %v1066_v0 }
 0x2d0   : > { %v1367_v13 = vmul.f32 -1.442695, %v1023_v5  ;;  %v1370_v14 = vmul.f32 -1.442695, %v1069_v9  ;;  %v1179_v5 = vmul.f32 %v1177_v49, %v1878_v52 }
 0x2d2   : > { %1487 = vpow2.f32 %v1367_v13 }
 0x2d3   : > { %1489 = vpow2.f32 %v1370_v14  ;;  %v1005_v16 = vpop.f32.mrf.mxu1  ;;  %v1054_v18 = vpop.f32.mrf.mxu0 }
 0x2d8   : > { %v1488_v20 = vpop.eup %1487 }
 0x2d9   : > { %v1490_v11 = vpop.eup %1489  ;;  %v1027_v10 = vadd.f32 1.0, %v1488_v20 }
 0x2da   : > { %v1073_v23 = vadd.f32 1.0, %v1490_v11 }
 0x2db   : > { %1491 = vrcp.f32 %v1027_v10  ;;  %v1098_v25 = vpop.f32.mrf.mxu1  ;;  %v1126_v26 = vpop.f32.mrf.mxu0  ;;  %v1039_v61 = vand.u32 2147483648, %v1027_v10  ;;  %v1037_v1 = vand.u32 2147483647, %v1027_v10  ;;  %vm1033_vm11 = vweird.f32 %v1027_v10 }
 0x2dc   : > { %1493 = vrcp.f32 %v1073_v23  ;;  %v1112_v27 = vadd.f32 %v1111_v37, %v1098_v25  ;;  %v1140_v28 = vadd.f32 %v1139_v58, %v1126_v26  ;;  %v1085_v2 = vand.u32 2147483648, %v1073_v23 }
 0x2dd   : > { %vm1079_vm12 = vweird.f32 %v1073_v23  ;;  %v1040_v34 = vor.u32 1.1754944e-38, %v1039_v61  ;;  %vm1038_vm15 = vcmp.eq.f32.partialorder %v1037_v1, 8.507059e+37 }
 0x2de   : > { %v1143_v24 = vadd.f32 %v1781_v47, %v1140_v28  ;;  %v1115_v30 = vadd.f32 %v1786_v50, %v1112_v27  ;;  %v1083_v47 = vand.u32 2147483647, %v1073_v23  ;;  %v1086_v6 = vor.u32 1.1754944e-38, %v1085_v2 }
 0x2e0   : > { %v1375_v31 = vmul.f32 -1.442695, %v1143_v24  ;;  %vm1084_vm0 = vcmp.eq.f32.partialorder %v1083_v47, 8.507059e+37 }
 0x2e1   : > { %v1492_v29 = vpop.eup %1491 }
 0x2e2   : > { %v1494_v32 = vpop.eup %1493  ;;  %v1029_v33 = vmul.f32 %v1492_v29, %v1027_v10  ;;  %1495 = vpow2.f32 %v1375_v31  ;;  %vm1034_vm2 = vweird.f32 %v1492_v29 }
 0x2e3   : > { %v1075_v21 = vmul.f32 %v1494_v32, %v1073_v23  ;;  %v1100_v22 = vpop.f32.mrf.mxu1  ;;  %v1128_v35 = vpop.f32.mrf.mxu0  ;;  %1497 = vtanh.f32 %v1115_v30  ;;  %vm1080_vm10 = vweird.f32 %v1494_v32  ;;  %vm1035_vm13 = vmor %vm1033_vm11, %vm1034_vm2 }
 0x2e4   : > { %v1030_v36 = vsub.f32 1.0, %v1029_v33  ;;  %vm1081_vm14 = vmor %vm1079_vm12, %vm1080_vm10 }
 0x2e5   : > { %v1076_v38 = vsub.f32 1.0, %v1075_v21 }
 0x2e6   : > { %v1031_v39 = vmul.f32 %v1492_v29, %v1030_v36 }
 0x2e7   : > { %v1077_v40 = vmul.f32 %v1494_v32, %v1076_v38 }
 0x2e8   : > { %v1032_v44 = vadd.f32 %v1492_v29, %v1031_v39  ;;  %v1496_v50 = vpop.eup %1495 }
 0x2e9   : > { %v1078_v7 = vadd.f32 %v1494_v32, %v1077_v40  ;;  %v1147_v43 = vadd.f32 1.0, %v1496_v50  ;;  %v1498_v45 = vpop.eup %1497 }
 0x2ea   : > { %v1036_v41 = vsel %vm1035_vm13, %v1492_v29, %v1032_v44 }
 0x2eb   : > { %v1041_v46 = vsel %vm1038_vm15, %v1040_v34, %v1036_v41  ;;  %v1082_v12 = vsel %vm1081_vm14, %v1494_v32, %v1078_v7  ;;  %1499 = vrcp.f32 %v1147_v43  ;;  %v1159_v57 = vand.u32 2147483648, %v1147_v43 }
 0x2ec   : > { %v1087_v15 = vsel %vm1084_vm0, %v1086_v6, %v1082_v12  ;;  %v1164_v17 = vmul.f32 %v1498_v45, %v1041_v46  ;;  %v1157_v37 = vand.u32 2147483647, %v1147_v43  ;;  %vm1153_vm5 = vweird.f32 %v1147_v43 }
 0x2ed   : > { %v1163_v48 = vmul.f32 %v1087_v15, %v1875_v42  ;;  %v1160_v60 = vor.u32 1.1754944e-38, %v1159_v57 }
 0x2ee   : > { %vm1158_vm1 = vcmp.eq.f32.partialorder %v1157_v37, 8.507059e+37 }
 0x2ef   : > { %v1165_v19 = vadd.f32 %v1164_v17, %v1163_v48 }
 0x2f1   : > { %v1181_v4 = vmul.f32 %v1171_v3, %v1165_v19  ;;  %v1500_v53 = vpop.eup %1499  ;;  %1501 = vtanh.f32 %v1165_v19 }
 0x2f2   : > { %v1149_v54 = vmul.f32 %v1500_v53, %v1147_v43  ;;  %vm1154_vm4 = vweird.f32 %v1500_v53 }
 0x2f3   : > { %v1183_v55 = vadd.f32 %v1182_v51, %v1181_v4  ;;  %vm1155_vm6 = vmor %vm1153_vm5, %vm1154_vm4 }
 0x2f4   : > { %v1150_v56 = vsub.f32 1.0, %v1149_v54 }
 0x2f5   : > { %1186 = vst.msk [vmem:[#allocation2] sm:$0x3] %vm1184_vm3, %v1183_v55 }
 0x2f6   : > { %v1151_v58 = vmul.f32 %v1500_v53, %v1150_v56 }
 0x2f7   : > { %v1502_v42 = vpop.eup %1501 }
 0x2f8   : > { %v1152_v59 = vadd.f32 %v1500_v53, %v1151_v58 }
 0x2fa   : > { %v1156_v62 = vsel %vm1155_vm6, %v1500_v53, %v1152_v59 }
 0x2fb   : > { %v1161_v8 = vsel %vm1158_vm1, %v1160_v60, %v1156_v62 }
 0x2fc   : > { %v1167_v63 = vmul.f32 %v1502_v42, %v1161_v8 }
 0x2fe   : > { %v1173_v0 = vmul.f32 %v1171_v3, %v1167_v63 }
 0x300   : > { %v1180_v9 = vadd.f32 %v1179_v5, %v1173_v0 }
 0x302   : > { %1185 = vst.msk [vmem:[#allocation8] sm:$0x3] %vm1184_vm3, %v1180_v9 }
 0x303   : > { %1401 = dma.vmem_to_hbm [thread:$0]  (%p1415_p8), %s1194_s27, 32, %s1196_s30, [#allocation5]  }
 0x304   : > { %1604 = dma.done.wait (%p1415_p8), [#allocation5], 32  }
 0x305   : > { %1606 = vsyncadd (%p1415_p8), [#allocation5], 4294967264 }
 0x306 PF: > { %s18_s18 = sadd.s32 1, %s1609_s18  }
 0x307   : > { %p15_p9 = scmp.ge.s32.totalorder %s18_s18, 4  }
 0x309   :  { %17 = sbr.rel (!%p15_p9) target bundleno = 3 (0x3), region = 89 }
 0x30e   :  { %1209 = vsyncpa [#allocation4], 1 }
 0x30f   :  { %1211 = vsyncpa [#allocation4 + $0x1], 1 }
 0x310   :  { %1212 = vsyncpa [#allocation7], 1 }
 0x311   :  { %1213 = vsyncpa [#allocation5], 1 }
 0x312   :  { %1215 = vsyncpa [#allocation5 + $0x1], 1 }

</bundles_post_ra>
